<compile_context>
chip_gen: v7x
topology: tpu7x:2x2x1
jax: 0.10.0
libtpu: 0.0.40
codegen_flags: <defaults>
</compile_context>

<pallas_src>
import functools
import math

import jax
import jax.numpy as jnp
from jax.experimental import pallas as pl
from jax.experimental.pallas import tpu as pltpu


# ----------------------------------------------------------------------------
# Fused forward kernel: one grid step == one batch element, everything in VMEM.
# ----------------------------------------------------------------------------
def _sa_edm_fused_kernel(
    t_ref, wcfg_ref,                 # SMEM: (B,) log(sigma)/4 and cfg*1000
    x_ref, cond_ref,                 # VMEM: (1, L, C) tokens, (1, 1, cond_dim) CLAP emb
    in_w, in_b, t1_w, t1_b, t2_w, t2_b,
    cond_w, cond_b, qkv_w, qkv_b, ao_w, ao_b,
    vc_w, vc_b, xo_w, xo_b, m1_w, m1_b, m2_w, m2_b,
    out_w, out_b,
    o_ref,                           # VMEM: (1, L, C) output tokens
    *, heads):
    f32 = jnp.float32
    b = pl.program_id(0)
    D = qkv_w.shape[0]
    dh = D // heads
    half = D // 2

    def lin(x, w_ref, b_ref):
        # MXU matmul + VPU bias add; bias is a (1, N) row -> broadcast over rows.
        return jnp.dot(x, w_ref[...], preferred_element_type=f32) + b_ref[...]

    # --- sinusoidal embeddings (guidance_scale_embedding formula), in-kernel ---
    neg = -math.log(10000.0) / (half - 1)
    idx = jax.lax.broadcasted_iota(jnp.int32, (1, half), 1).astype(f32)
    freqs = jnp.exp(idx * neg)                                   # (1, half)

    def sincos(val):                                             # scalar -> (1, D)
        arg = val * freqs
        return jnp.concatenate([jnp.sin(arg), jnp.cos(arg)], axis=-1)

    t_feat = sincos(t_ref[b])                                    # timestep features
    w_emb = sincos(wcfg_ref[b])                                  # guidance-scale emb

    # --- timestep MLP + global conditioning ---
    t_emb = lin(t_feat, t1_w, t1_b)
    t_emb = t_emb * jax.nn.sigmoid(t_emb)                        # SiLU
    t_emb = lin(t_emb, t2_w, t2_b)
    g = t_emb + w_emb                                            # (1, D)

    # --- CLAP conditioning token ---
    cond_tok = lin(cond_ref[0].astype(f32), cond_w, cond_b)      # (1, D)
    # Cross-attention with a single key/value token and an all-True mask is the
    # identity on vc (softmax over one logit == 1), so the qx / kc projections and
    # the attention itself are dropped with bit-exact results:
    vc = lin(cond_tok, vc_w, vc_b)                               # (1, D)
    xo_add = lin(vc, xo_w, xo_b)                                 # (1, D), broadcast over L

    # --- input projection + global cond (residual adds stay in VMEM) ---
    h = lin(x_ref[0].astype(f32), in_w, in_b) + g                # (L, D)

    # --- self-attention: all heads in this grid step, static lane slices ---
    qkv = lin(h, qkv_w, qkv_b)                                   # (L, 3D)
    q = qkv[:, :D]
    k = qkv[:, D:2 * D]
    v = qkv[:, 2 * D:]
    scale = 1.0 / math.sqrt(dh)
    heads_out = []
    for hh in range(heads):
        sl = slice(hh * dh, (hh + 1) * dh)
        qh, kh, vh = q[:, sl], k[:, sl], v[:, sl]
        s = jax.lax.dot_general(qh, kh, (((1,), (1,)), ((), ())),
                                preferred_element_type=f32) * scale   # (L, L)
        s = s - jnp.max(s, axis=-1, keepdims=True)
        p = jnp.exp(s)
        p = p * pl.reciprocal(jnp.sum(p, axis=-1, keepdims=True), approx=True)
        heads_out.append(jnp.dot(p, vh, preferred_element_type=f32))  # (L, dh)
    sa = jnp.concatenate(heads_out, axis=-1)                     # (L, D)
    h = h + lin(sa, ao_w, ao_b)

    # --- (eliminated) cross-attention residual ---
    h = h + xo_add

    # --- MLP ---
    m = jax.nn.gelu(lin(h, m1_w, m1_b))                          # (L, 4D)
    h = h + lin(m, m2_w, m2_b)

    # --- output projection back to io_channels ---
    o_ref[0] = lin(h, out_w, out_b).astype(o_ref.dtype)          # (L, C)


# ----------------------------------------------------------------------------
# Deterministic parameter init (synthetic single-block DiT backbone)
# ----------------------------------------------------------------------------
def init_params(key, C, D, cond_dim):
    names_shapes = [
        ("in", C, D),        # pointwise conv1d C->D == channel linear
        ("t1", D, D),        # timestep MLP
        ("t2", D, D),
        ("cond", cond_dim, D),
        ("qkv", D, 3 * D),
        ("ao", D, D),
        ("qx", D, D),        # algebraically dead (T=1 cross-attn), kept for parity
        ("kvc", D, 2 * D),   # only the v half is used
        ("xo", D, D),
        ("m1", D, 4 * D),
        ("m2", 4 * D, D),
        ("out", D, C),
    ]
    keys = jax.random.split(key, len(names_shapes))
    params = {}
    for k, (name, fi, fo) in zip(keys, names_shapes):
        params[f"{name}_w"] = (
            jax.random.normal(k, (fi, fo), jnp.float32) / jnp.sqrt(jnp.float32(fi))
        )
        params[f"{name}_b"] = jnp.zeros((fo,), jnp.float32)
    return params


# ----------------------------------------------------------------------------
# SA_EDM forward (model_type='dit', teacher=False, cfg given, s_timesteps=None)
# ----------------------------------------------------------------------------
def sa_edm_forward(params, latents, timesteps, encoder_hidden_states, cfg, *, heads):
    B, C, L = latents.shape
    D = params["in_w"].shape[1]
    cond_dim = encoder_hidden_states.shape[2]
    T = encoder_hidden_states.shape[1]
    assert D % 2 == 0 and D >= 4 and D % heads == 0
    assert T == 1  # CLAP: one pooled token, all-True mask => cross-attn degenerates

    # EDM preconditioning + guidance scaling (a couple of scalar XLA ops).
    t_vals = (jnp.log(timesteps.reshape(-1)) / 4.0).astype(jnp.float32)   # (B,)
    w_vals = (cfg.reshape(-1) * 1000.0).astype(jnp.float32)               # (B,)

    # NCL -> token-major (tiny; 128 floats per sample).
    x_tok = jnp.transpose(latents, (0, 2, 1)).astype(jnp.float32)         # (B, L, C)

    # Only the v-half of the kvc projection survives the degenerate cross-attn.
    vc_w = params["kvc_w"][:, D:]
    vc_b = params["kvc_b"][D:]

    def b2(v):  # biases as (1, N) rows (2-D, broadcast along sublanes in-kernel)
        return v.reshape(1, -1)

    weights = [
        params["in_w"], b2(params["in_b"]),
        params["t1_w"], b2(params["t1_b"]),
        params["t2_w"], b2(params["t2_b"]),
        params["cond_w"], b2(params["cond_b"]),
        params["qkv_w"], b2(params["qkv_b"]),
        params["ao_w"], b2(params["ao_b"]),
        vc_w, b2(vc_b),
        params["xo_w"], b2(params["xo_b"]),
        params["m1_w"], b2(params["m1_b"]),
        params["m2_w"], b2(params["m2_b"]),
        params["out_w"], b2(params["out_b"]),
    ]

    smem_spec = pl.BlockSpec(memory_space=pltpu.MemorySpace.SMEM)
    full2d = lambda a: pl.BlockSpec(a.shape, lambda b: (0, 0))  # constant index -> no re-DMA

    in_specs = [
        smem_spec,                                                # t = log(sigma)/4
        smem_spec,                                                # cfg * 1000
        pl.BlockSpec((1, L, C), lambda b: (b, 0, 0)),             # latent tokens
        pl.BlockSpec((1, T, cond_dim), lambda b: (b, 0, 0)),      # CLAP embedding
    ] + [full2d(w) for w in weights]

    out_tok = pl.pallas_call(
        functools.partial(_sa_edm_fused_kernel, heads=heads),
        out_shape=jax.ShapeDtypeStruct((B, L, C), jnp.float32),
        grid=(B,),
        in_specs=in_specs,
        out_specs=pl.BlockSpec((1, L, C), lambda b: (b, 0, 0)),
        compiler_params=pltpu.CompilerParams(
            dimension_semantics=("parallel",),   # shards batch over the 2 TCs on v7x
        ),
    )(t_vals, w_vals, x_tok, encoder_hidden_states, *weights)

    # tokens -> NCL (tiny transpose).  TODO(synk): at real D/L sizes, cast weights /
    # activations to bf16 for the MXU and tile L with a VMEM-aware block size.
    return jnp.transpose(out_tok, (0, 2, 1))


# ----------------------------------------------------------------------------
# Pure-jnp reference (original un-simplified math, incl. full T=1 cross-attention)
# used only to validate the fused kernel.
# ----------------------------------------------------------------------------
def _ref_sincos(v, dim):
    half = dim // 2
    emb = math.log(10000.0) / (half - 1)
    freqs = jnp.exp(jnp.arange(half, dtype=jnp.float32) * -emb)
    arg = v.astype(jnp.float32)[:, None] * freqs[None, :]
    return jnp.concatenate([jnp.sin(arg), jnp.cos(arg)], axis=1)


def _ref_linear(x, w, b):
    return x @ w + b


def sa_edm_reference(params, latents, timesteps, ehs, cfg, *, heads):
    B, C, L = latents.shape
    D = params["in_w"].shape[1]
    dh = D // heads
    t = jnp.log(timesteps.reshape(-1)) / 4.0
    w_embedding = _ref_sincos(cfg.reshape(-1) * 1000.0, D)
    t_emb = _ref_linear(_ref_sincos(t, D), params["t1_w"], params["t1_b"])
    t_emb = t_emb * jax.nn.sigmoid(t_emb)
    t_emb = _ref_linear(t_emb, params["t2_w"], params["t2_b"])
    g = t_emb + w_embedding

    cond = _ref_linear(ehs, params["cond_w"], params["cond_b"])           # (B, T, D)
    T = cond.shape[1]

    x = jnp.transpose(latents, (0, 2, 1))
    h = _ref_linear(x, params["in_w"], params["in_b"]) + g[:, None, :]

    def split(z, length):
        return z.reshape(B, length, heads, dh).transpose(0, 2, 1, 3)

    def merge(z, length):
        return z.transpose(0, 2, 1, 3).reshape(B, length, D)

    def attn(q, k, v):
        s = jnp.einsum("bhqd,bhkd->bhqk", q, k) / math.sqrt(dh)
        p = jax.nn.softmax(s, axis=-1)
        return jnp.einsum("bhqk,bhkd->bhqd", p, v)

    qkv = _ref_linear(h, params["qkv_w"], params["qkv_b"])
    q, k, v = jnp.split(qkv, 3, axis=-1)
    sa = merge(attn(split(q, L), split(k, L), split(v, L)), L)
    h = h + _ref_linear(sa, params["ao_w"], params["ao_b"])

    qx = _ref_linear(h, params["qx_w"], params["qx_b"])
    kvc = _ref_linear(cond, params["kvc_w"], params["kvc_b"])
    kc, vc = jnp.split(kvc, 2, axis=-1)
    xa = merge(attn(split(qx, L), split(kc, T), split(vc, T)), L)
    h = h + _ref_linear(xa, params["xo_w"], params["xo_b"])

    m = jax.nn.gelu(_ref_linear(h, params["m1_w"], params["m1_b"]))
    h = h + _ref_linear(m, params["m2_w"], params["m2_b"])
    out = _ref_linear(h, params["out_w"], params["out_b"])
    return jnp.transpose(out, (0, 2, 1))


# ----------------------------------------------------------------------------
if __name__ == "__main__":
    key = jax.random.PRNGKey(0)
    B, C, L = 2, 4, 16          # batch, io_channels, latent sequence length
    D, cond_dim, heads = 32, 16, 4
    T_text = 1                  # CLAP branch: one pooled embedding token per sample

    k_lat, k_t, k_cond, k_par = jax.random.split(key, 4)
    latents = jax.random.normal(k_lat, (B, C, L), jnp.float32)
    timesteps = jnp.exp(jax.random.normal(k_t, (B,), jnp.float32))  # positive sigmas
    cfg = jnp.array([3.0, 7.5], jnp.float32)
    # synthetic CLAP text embedding (see TODO(synk) above)
    encoder_hidden_states = jax.random.normal(k_cond, (B, T_text, cond_dim), jnp.float32)

    params = init_params(k_par, C, D, cond_dim)

    fwd = jax.jit(functools.partial(sa_edm_forward, heads=heads))
    F_x = fwd(params, latents, timesteps, encoder_hidden_states, cfg)
    F_x = jax.block_until_ready(F_x)
    assert F_x.shape == (B, C, L) and F_x.dtype == jnp.float32

    # sanity-check the fused kernel (incl. the eliminated cross-attention) against
    # the full pure-jnp reference; approx reciprocal => loose but bug-catching tol.
    F_ref = jax.block_until_ready(
        sa_edm_reference(params, latents, timesteps, encoder_hidden_states, cfg, heads=heads)
    )
    max_err = float(jnp.max(jnp.abs(F_x - F_ref)))
    assert max_err < 5e-2, f"fused kernel deviates from reference: max_err={max_err}"

    print("KERNEL_OK")
</pallas_src>

<mosaic_0001>
module attributes {stable_mosaic.version = 11 : i64} {
  func.func @_sa_edm_fused_kernel(%arg0: i32, %arg1: memref<2xf32, #tpu.memory_space<smem>>, %arg2: memref<2xf32, #tpu.memory_space<smem>>, %arg3: memref<1x16x4xf32, #tpu.memory_space<vmem>>, %arg4: memref<1x1x16xf32, #tpu.memory_space<vmem>>, %arg5: memref<4x32xf32, #tpu.memory_space<vmem>>, %arg6: memref<1x32xf32, #tpu.memory_space<vmem>>, %arg7: memref<32x32xf32, #tpu.memory_space<vmem>>, %arg8: memref<1x32xf32, #tpu.memory_space<vmem>>, %arg9: memref<32x32xf32, #tpu.memory_space<vmem>>, %arg10: memref<1x32xf32, #tpu.memory_space<vmem>>, %arg11: memref<16x32xf32, #tpu.memory_space<vmem>>, %arg12: memref<1x32xf32, #tpu.memory_space<vmem>>, %arg13: memref<32x96xf32, #tpu.memory_space<vmem>>, %arg14: memref<1x96xf32, #tpu.memory_space<vmem>>, %arg15: memref<32x32xf32, #tpu.memory_space<vmem>>, %arg16: memref<1x32xf32, #tpu.memory_space<vmem>>, %arg17: memref<32x32xf32, #tpu.memory_space<vmem>>, %arg18: memref<1x32xf32, #tpu.memory_space<vmem>>, %arg19: memref<32x32xf32, #tpu.memory_space<vmem>>, %arg20: memref<1x32xf32, #tpu.memory_space<vmem>>, %arg21: memref<32x128xf32, #tpu.memory_space<vmem>>, %arg22: memref<1x128xf32, #tpu.memory_space<vmem>>, %arg23: memref<128x32xf32, #tpu.memory_space<vmem>>, %arg24: memref<1x32xf32, #tpu.memory_space<vmem>>, %arg25: memref<32x4xf32, #tpu.memory_space<vmem>>, %arg26: memref<1x4xf32, #tpu.memory_space<vmem>>, %arg27: memref<1x16x4xf32, #tpu.memory_space<vmem>>) attributes {dimension_semantics = [#tpu.dimension_semantics<parallel>], iteration_bounds = array<i64: 2>, scalar_prefetch = 0 : i64, scratch_operands = 0 : i64, tpu.core_type = #tpu.core_type<tc>, window_params = [{transform_indices = @transform_0, window_bounds = array<i64: 2>}, {transform_indices = @transform_1, window_bounds = array<i64: 2>}, {transform_indices = @transform_2, window_bounds = array<i64: 1, 16, 4>}, {transform_indices = @transform_3, window_bounds = array<i64: 1, 1, 16>}, {pipeline_mode = #tpu.pipeline_mode<synchronous>, transform_indices = @transform_4, window_bounds = array<i64: 4, 32>}, {pipeline_mode = #tpu.pipeline_mode<synchronous>, transform_indices = @transform_5, window_bounds = array<i64: 1, 32>}, {pipeline_mode = #tpu.pipeline_mode<synchronous>, transform_indices = @transform_6, window_bounds = array<i64: 32, 32>}, {pipeline_mode = #tpu.pipeline_mode<synchronous>, transform_indices = @transform_7, window_bounds = array<i64: 1, 32>}, {pipeline_mode = #tpu.pipeline_mode<synchronous>, transform_indices = @transform_8, window_bounds = array<i64: 32, 32>}, {pipeline_mode = #tpu.pipeline_mode<synchronous>, transform_indices = @transform_9, window_bounds = array<i64: 1, 32>}, {pipeline_mode = #tpu.pipeline_mode<synchronous>, transform_indices = @transform_10, window_bounds = array<i64: 16, 32>}, {pipeline_mode = #tpu.pipeline_mode<synchronous>, transform_indices = @transform_11, window_bounds = array<i64: 1, 32>}, {pipeline_mode = #tpu.pipeline_mode<synchronous>, transform_indices = @transform_12, window_bounds = array<i64: 32, 96>}, {pipeline_mode = #tpu.pipeline_mode<synchronous>, transform_indices = @transform_13, window_bounds = array<i64: 1, 96>}, {pipeline_mode = #tpu.pipeline_mode<synchronous>, transform_indices = @transform_14, window_bounds = array<i64: 32, 32>}, {pipeline_mode = #tpu.pipeline_mode<synchronous>, transform_indices = @transform_15, window_bounds = array<i64: 1, 32>}, {pipeline_mode = #tpu.pipeline_mode<synchronous>, transform_indices = @transform_16, window_bounds = array<i64: 32, 32>}, {pipeline_mode = #tpu.pipeline_mode<synchronous>, transform_indices = @transform_17, window_bounds = array<i64: 1, 32>}, {pipeline_mode = #tpu.pipeline_mode<synchronous>, transform_indices = @transform_18, window_bounds = array<i64: 32, 32>}, {pipeline_mode = #tpu.pipeline_mode<synchronous>, transform_indices = @transform_19, window_bounds = array<i64: 1, 32>}, {pipeline_mode = #tpu.pipeline_mode<synchronous>, transform_indices = @transform_20, window_bounds = array<i64: 32, 128>}, {pipeline_mode = #tpu.pipeline_mode<synchronous>, transform_indices = @transform_21, window_bounds = array<i64: 1, 128>}, {pipeline_mode = #tpu.pipeline_mode<synchronous>, transform_indices = @transform_22, window_bounds = array<i64: 128, 32>}, {pipeline_mode = #tpu.pipeline_mode<synchronous>, transform_indices = @transform_23, window_bounds = array<i64: 1, 32>}, {pipeline_mode = #tpu.pipeline_mode<synchronous>, transform_indices = @transform_24, window_bounds = array<i64: 32, 4>}, {pipeline_mode = #tpu.pipeline_mode<synchronous>, transform_indices = @transform_25, window_bounds = array<i64: 1, 4>}, {transform_indices = @transform_26, window_bounds = array<i64: 1, 16, 4>}]} {
    %0 = tpu.iota {dimensions = array<i32: 1>} : vector<1x16xi32>
    %1 = arith.sitofp %0 : vector<1x16xi32> to vector<1x16xf32>
    %cst = arith.constant -0.614022672 : f32
    %2 = vector.broadcast %cst : f32 to vector<1x16xf32>
    %3 = arith.mulf %1, %2 : vector<1x16xf32>
    %4 = math.exp %3 : vector<1x16xf32>
    %5 = arith.index_cast %arg0 : i32 to index
    %6 = memref.load %arg1[%5] : memref<2xf32, #tpu.memory_space<smem>>
    %7 = vector.broadcast %6 : f32 to vector<1x16xf32>
    %8 = arith.mulf %7, %4 : vector<1x16xf32>
    %9 = math.sin %8 : vector<1x16xf32>
    %10 = math.cos %8 : vector<1x16xf32>
    %11 = tpu.concatenate %9, %10 in 1 : vector<1x16xf32>, vector<1x16xf32> -> vector<1x32xf32>
    %12 = arith.index_cast %arg0 : i32 to index
    %13 = memref.load %arg2[%12] : memref<2xf32, #tpu.memory_space<smem>>
    %14 = vector.broadcast %13 : f32 to vector<1x16xf32>
    %15 = arith.mulf %14, %4 : vector<1x16xf32>
    %16 = math.sin %15 : vector<1x16xf32>
    %17 = math.cos %15 : vector<1x16xf32>
    %18 = tpu.concatenate %16, %17 in 1 : vector<1x16xf32>, vector<1x16xf32> -> vector<1x32xf32>
    %c0 = arith.constant 0 : index
    %c0_0 = arith.constant 0 : index
    %19 = vector.load %arg7[%c0, %c0_0] : memref<32x32xf32, #tpu.memory_space<vmem>>, vector<32x32xf32>
    %cst_1 = arith.constant dense<0.000000e+00> : vector<1x32xf32>
    %20 = tpu.matmul %11, %19, %cst_1 {dimension_numbers = #tpu.dot_dimension_numbers<[1], [0], [0], [1], [0, 0, 1, 1], [], []>} : vector<1x32xf32>, vector<32x32xf32>, vector<1x32xf32> -> vector<1x32xf32>
    %c0_2 = arith.constant 0 : index
    %c0_3 = arith.constant 0 : index
    %21 = vector.load %arg8[%c0_2, %c0_3] : memref<1x32xf32, #tpu.memory_space<vmem>>, vector<1x32xf32>
    %22 = arith.addf %20, %21 : vector<1x32xf32>
    %23 = arith.negf %22 : vector<1x32xf32>
    %24 = math.exp %23 : vector<1x32xf32>
    %cst_4 = arith.constant 1.000000e+00 : f32
    %25 = vector.broadcast %cst_4 : f32 to vector<1x32xf32>
    %26 = arith.addf %25, %24 : vector<1x32xf32>
    %27 = arith.divf %25, %26 : vector<1x32xf32>
    %28 = arith.mulf %22, %27 : vector<1x32xf32>
    %c0_5 = arith.constant 0 : index
    %c0_6 = arith.constant 0 : index
    %29 = vector.load %arg9[%c0_5, %c0_6] : memref<32x32xf32, #tpu.memory_space<vmem>>, vector<32x32xf32>
    %cst_7 = arith.constant dense<0.000000e+00> : vector<1x32xf32>
    %30 = tpu.matmul %28, %29, %cst_7 {dimension_numbers = #tpu.dot_dimension_numbers<[1], [0], [0], [1], [0, 0, 1, 1], [], []>} : vector<1x32xf32>, vector<32x32xf32>, vector<1x32xf32> -> vector<1x32xf32>
    %c0_8 = arith.constant 0 : index
    %c0_9 = arith.constant 0 : index
    %31 = vector.load %arg10[%c0_8, %c0_9] : memref<1x32xf32, #tpu.memory_space<vmem>>, vector<1x32xf32>
    %32 = arith.addf %30, %31 : vector<1x32xf32>
    %33 = arith.addf %32, %18 : vector<1x32xf32>
    %c0_10 = arith.constant 0 : index
    %c0_11 = arith.constant 0 : index
    %c0_12 = arith.constant 0 : index
    %34 = vector.load %arg4[%c0_10, %c0_11, %c0_12] : memref<1x1x16xf32, #tpu.memory_space<vmem>>, vector<1x1x16xf32>
    %35 = vector.shape_cast %34 : vector<1x1x16xf32> to vector<1x16xf32>
    %c0_13 = arith.constant 0 : index
    %c0_14 = arith.constant 0 : index
    %36 = vector.load %arg11[%c0_13, %c0_14] : memref<16x32xf32, #tpu.memory_space<vmem>>, vector<16x32xf32>
    %cst_15 = arith.constant dense<0.000000e+00> : vector<1x32xf32>
    %37 = tpu.matmul %35, %36, %cst_15 {dimension_numbers = #tpu.dot_dimension_numbers<[1], [0], [0], [1], [0, 0, 1, 1], [], []>} : vector<1x16xf32>, vector<16x32xf32>, vector<1x32xf32> -> vector<1x32xf32>
    %c0_16 = arith.constant 0 : index
    %c0_17 = arith.constant 0 : index
    %38 = vector.load %arg12[%c0_16, %c0_17] : memref<1x32xf32, #tpu.memory_space<vmem>>, vector<1x32xf32>
    %39 = arith.addf %37, %38 : vector<1x32xf32>
    %c0_18 = arith.constant 0 : index
    %c0_19 = arith.constant 0 : index
    %40 = vector.load %arg17[%c0_18, %c0_19] : memref<32x32xf32, #tpu.memory_space<vmem>>, vector<32x32xf32>
    %cst_20 = arith.constant dense<0.000000e+00> : vector<1x32xf32>
    %41 = tpu.matmul %39, %40, %cst_20 {dimension_numbers = #tpu.dot_dimension_numbers<[1], [0], [0], [1], [0, 0, 1, 1], [], []>} : vector<1x32xf32>, vector<32x32xf32>, vector<1x32xf32> -> vector<1x32xf32>
    %c0_21 = arith.constant 0 : index
    %c0_22 = arith.constant 0 : index
    %42 = vector.load %arg18[%c0_21, %c0_22] : memref<1x32xf32, #tpu.memory_space<vmem>>, vector<1x32xf32>
    %43 = arith.addf %41, %42 : vector<1x32xf32>
    %c0_23 = arith.constant 0 : index
    %c0_24 = arith.constant 0 : index
    %44 = vector.load %arg19[%c0_23, %c0_24] : memref<32x32xf32, #tpu.memory_space<vmem>>, vector<32x32xf32>
    %cst_25 = arith.constant dense<0.000000e+00> : vector<1x32xf32>
    %45 = tpu.matmul %43, %44, %cst_25 {dimension_numbers = #tpu.dot_dimension_numbers<[1], [0], [0], [1], [0, 0, 1, 1], [], []>} : vector<1x32xf32>, vector<32x32xf32>, vector<1x32xf32> -> vector<1x32xf32>
    %c0_26 = arith.constant 0 : index
    %c0_27 = arith.constant 0 : index
    %46 = vector.load %arg20[%c0_26, %c0_27] : memref<1x32xf32, #tpu.memory_space<vmem>>, vector<1x32xf32>
    %47 = arith.addf %45, %46 : vector<1x32xf32>
    %c0_28 = arith.constant 0 : index
    %c0_29 = arith.constant 0 : index
    %c0_30 = arith.constant 0 : index
    %48 = vector.load %arg3[%c0_28, %c0_29, %c0_30] : memref<1x16x4xf32, #tpu.memory_space<vmem>>, vector<1x16x4xf32>
    %49 = vector.shape_cast %48 : vector<1x16x4xf32> to vector<16x4xf32>
    %c0_31 = arith.constant 0 : index
    %c0_32 = arith.constant 0 : index
    %50 = vector.load %arg5[%c0_31, %c0_32] : memref<4x32xf32, #tpu.memory_space<vmem>>, vector<4x32xf32>
    %cst_33 = arith.constant dense<0.000000e+00> : vector<16x32xf32>
    %51 = tpu.matmul %49, %50, %cst_33 {dimension_numbers = #tpu.dot_dimension_numbers<[1], [0], [0], [1], [0, 0, 1, 1], [], []>} : vector<16x4xf32>, vector<4x32xf32>, vector<16x32xf32> -> vector<16x32xf32>
    %c0_34 = arith.constant 0 : index
    %c0_35 = arith.constant 0 : index
    %52 = vector.load %arg6[%c0_34, %c0_35] : memref<1x32xf32, #tpu.memory_space<vmem>>, vector<1x32xf32>
    %53 = vector.broadcast %52 : vector<1x32xf32> to vector<16x32xf32>
    %54 = arith.addf %51, %53 : vector<16x32xf32>
    %55 = vector.broadcast %33 : vector<1x32xf32> to vector<16x32xf32>
    %56 = arith.addf %54, %55 : vector<16x32xf32>
    %c0_36 = arith.constant 0 : index
    %c0_37 = arith.constant 0 : index
    %57 = vector.load %arg13[%c0_36, %c0_37] : memref<32x96xf32, #tpu.memory_space<vmem>>, vector<32x96xf32>
    %cst_38 = arith.constant dense<0.000000e+00> : vector<16x96xf32>
    %58 = tpu.matmul %56, %57, %cst_38 {dimension_numbers = #tpu.dot_dimension_numbers<[1], [0], [0], [1], [0, 0, 1, 1], [], []>} : vector<16x32xf32>, vector<32x96xf32>, vector<16x96xf32> -> vector<16x96xf32>
    %c0_39 = arith.constant 0 : index
    %c0_40 = arith.constant 0 : index
    %59 = vector.load %arg14[%c0_39, %c0_40] : memref<1x96xf32, #tpu.memory_space<vmem>>, vector<1x96xf32>
    %60 = vector.broadcast %59 : vector<1x96xf32> to vector<16x96xf32>
    %61 = arith.addf %58, %60 : vector<16x96xf32>
    %62 = vector.extract_strided_slice %61 {offsets = [0, 0], sizes = [16, 32], strides = [1, 1]} : vector<16x96xf32> to vector<16x32xf32>
    %63 = vector.extract_strided_slice %61 {offsets = [0, 32], sizes = [16, 32], strides = [1, 1]} : vector<16x96xf32> to vector<16x32xf32>
    %64 = vector.extract_strided_slice %61 {offsets = [0, 64], sizes = [16, 32], strides = [1, 1]} : vector<16x96xf32> to vector<16x32xf32>
    %65 = vector.extract_strided_slice %62 {offsets = [0, 0], sizes = [16, 8], strides = [1, 1]} : vector<16x32xf32> to vector<16x8xf32>
    %66 = vector.extract_strided_slice %63 {offsets = [0, 0], sizes = [16, 8], strides = [1, 1]} : vector<16x32xf32> to vector<16x8xf32>
    %67 = vector.extract_strided_slice %64 {offsets = [0, 0], sizes = [16, 8], strides = [1, 1]} : vector<16x32xf32> to vector<16x8xf32>
    %cst_41 = arith.constant dense<0.000000e+00> : vector<16x16xf32>
    %68 = tpu.matmul %65, %66, %cst_41 {dimension_numbers = #tpu.dot_dimension_numbers<[1], [1], [0], [0], [0, 0, 1, 0], [], []>} : vector<16x8xf32>, vector<16x8xf32>, vector<16x16xf32> -> vector<16x16xf32>
    %cst_42 = arith.constant 0.353553385 : f32
    %69 = vector.broadcast %cst_42 : f32 to vector<16x16xf32>
    %70 = arith.mulf %68, %69 : vector<16x16xf32>
    %cst_43 = arith.constant dense<0xFF800000> : vector<16xf32>
    %71 = vector.multi_reduction <maximumf>, %70, %cst_43 [1] : vector<16x16xf32> to vector<16xf32>
    %72 = vector.shape_cast %71 : vector<16xf32> to vector<16x1xf32>
    %73 = vector.broadcast %72 : vector<16x1xf32> to vector<16x16xf32>
    %74 = arith.subf %70, %73 : vector<16x16xf32>
    %75 = math.exp %74 : vector<16x16xf32>
    %cst_44 = arith.constant dense<0.000000e+00> : vector<16xf32>
    %76 = vector.multi_reduction <add>, %75, %cst_44 [1] : vector<16x16xf32> to vector<16xf32>
    %77 = vector.shape_cast %76 : vector<16xf32> to vector<16x1xf32>
    %78 = tpu.reciprocal %77 {approx = true} : vector<16x1xf32> -> vector<16x1xf32>
    %79 = vector.broadcast %78 : vector<16x1xf32> to vector<16x16xf32>
    %80 = arith.mulf %75, %79 : vector<16x16xf32>
    %cst_45 = arith.constant dense<0.000000e+00> : vector<16x8xf32>
    %81 = tpu.matmul %80, %67, %cst_45 {dimension_numbers = #tpu.dot_dimension_numbers<[1], [0], [0], [1], [0, 0, 1, 1], [], []>} : vector<16x16xf32>, vector<16x8xf32>, vector<16x8xf32> -> vector<16x8xf32>
    %82 = vector.extract_strided_slice %62 {offsets = [0, 8], sizes = [16, 8], strides = [1, 1]} : vector<16x32xf32> to vector<16x8xf32>
    %83 = vector.extract_strided_slice %63 {offsets = [0, 8], sizes = [16, 8], strides = [1, 1]} : vector<16x32xf32> to vector<16x8xf32>
    %84 = vector.extract_strided_slice %64 {offsets = [0, 8], sizes = [16, 8], strides = [1, 1]} : vector<16x32xf32> to vector<16x8xf32>
    %cst_46 = arith.constant dense<0.000000e+00> : vector<16x16xf32>
    %85 = tpu.matmul %82, %83, %cst_46 {dimension_numbers = #tpu.dot_dimension_numbers<[1], [1], [0], [0], [0, 0, 1, 0], [], []>} : vector<16x8xf32>, vector<16x8xf32>, vector<16x16xf32> -> vector<16x16xf32>
    %cst_47 = arith.constant 0.353553385 : f32
    %86 = vector.broadcast %cst_47 : f32 to vector<16x16xf32>
    %87 = arith.mulf %85, %86 : vector<16x16xf32>
    %cst_48 = arith.constant dense<0xFF800000> : vector<16xf32>
    %88 = vector.multi_reduction <maximumf>, %87, %cst_48 [1] : vector<16x16xf32> to vector<16xf32>
    %89 = vector.shape_cast %88 : vector<16xf32> to vector<16x1xf32>
    %90 = vector.broadcast %89 : vector<16x1xf32> to vector<16x16xf32>
    %91 = arith.subf %87, %90 : vector<16x16xf32>
    %92 = math.exp %91 : vector<16x16xf32>
    %cst_49 = arith.constant dense<0.000000e+00> : vector<16xf32>
    %93 = vector.multi_reduction <add>, %92, %cst_49 [1] : vector<16x16xf32> to vector<16xf32>
    %94 = vector.shape_cast %93 : vector<16xf32> to vector<16x1xf32>
    %95 = tpu.reciprocal %94 {approx = true} : vector<16x1xf32> -> vector<16x1xf32>
    %96 = vector.broadcast %95 : vector<16x1xf32> to vector<16x16xf32>
    %97 = arith.mulf %92, %96 : vector<16x16xf32>
    %cst_50 = arith.constant dense<0.000000e+00> : vector<16x8xf32>
    %98 = tpu.matmul %97, %84, %cst_50 {dimension_numbers = #tpu.dot_dimension_numbers<[1], [0], [0], [1], [0, 0, 1, 1], [], []>} : vector<16x16xf32>, vector<16x8xf32>, vector<16x8xf32> -> vector<16x8xf32>
    %99 = vector.extract_strided_slice %62 {offsets = [0, 16], sizes = [16, 8], strides = [1, 1]} : vector<16x32xf32> to vector<16x8xf32>
    %100 = vector.extract_strided_slice %63 {offsets = [0, 16], sizes = [16, 8], strides = [1, 1]} : vector<16x32xf32> to vector<16x8xf32>
    %101 = vector.extract_strided_slice %64 {offsets = [0, 16], sizes = [16, 8], strides = [1, 1]} : vector<16x32xf32> to vector<16x8xf32>
    %cst_51 = arith.constant dense<0.000000e+00> : vector<16x16xf32>
    %102 = tpu.matmul %99, %100, %cst_51 {dimension_numbers = #tpu.dot_dimension_numbers<[1], [1], [0], [0], [0, 0, 1, 0], [], []>} : vector<16x8xf32>, vector<16x8xf32>, vector<16x16xf32> -> vector<16x16xf32>
    %cst_52 = arith.constant 0.353553385 : f32
    %103 = vector.broadcast %cst_52 : f32 to vector<16x16xf32>
    %104 = arith.mulf %102, %103 : vector<16x16xf32>
    %cst_53 = arith.constant dense<0xFF800000> : vector<16xf32>
    %105 = vector.multi_reduction <maximumf>, %104, %cst_53 [1] : vector<16x16xf32> to vector<16xf32>
    %106 = vector.shape_cast %105 : vector<16xf32> to vector<16x1xf32>
    %107 = vector.broadcast %106 : vector<16x1xf32> to vector<16x16xf32>
    %108 = arith.subf %104, %107 : vector<16x16xf32>
    %109 = math.exp %108 : vector<16x16xf32>
    %cst_54 = arith.constant dense<0.000000e+00> : vector<16xf32>
    %110 = vector.multi_reduction <add>, %109, %cst_54 [1] : vector<16x16xf32> to vector<16xf32>
    %111 = vector.shape_cast %110 : vector<16xf32> to vector<16x1xf32>
    %112 = tpu.reciprocal %111 {approx = true} : vector<16x1xf32> -> vector<16x1xf32>
    %113 = vector.broadcast %112 : vector<16x1xf32> to vector<16x16xf32>
    %114 = arith.mulf %109, %113 : vector<16x16xf32>
    %cst_55 = arith.constant dense<0.000000e+00> : vector<16x8xf32>
    %115 = tpu.matmul %114, %101, %cst_55 {dimension_numbers = #tpu.dot_dimension_numbers<[1], [0], [0], [1], [0, 0, 1, 1], [], []>} : vector<16x16xf32>, vector<16x8xf32>, vector<16x8xf32> -> vector<16x8xf32>
    %116 = vector.extract_strided_slice %62 {offsets = [0, 24], sizes = [16, 8], strides = [1, 1]} : vector<16x32xf32> to vector<16x8xf32>
    %117 = vector.extract_strided_slice %63 {offsets = [0, 24], sizes = [16, 8], strides = [1, 1]} : vector<16x32xf32> to vector<16x8xf32>
    %118 = vector.extract_strided_slice %64 {offsets = [0, 24], sizes = [16, 8], strides = [1, 1]} : vector<16x32xf32> to vector<16x8xf32>
    %cst_56 = arith.constant dense<0.000000e+00> : vector<16x16xf32>
    %119 = tpu.matmul %116, %117, %cst_56 {dimension_numbers = #tpu.dot_dimension_numbers<[1], [1], [0], [0], [0, 0, 1, 0], [], []>} : vector<16x8xf32>, vector<16x8xf32>, vector<16x16xf32> -> vector<16x16xf32>
    %cst_57 = arith.constant 0.353553385 : f32
    %120 = vector.broadcast %cst_57 : f32 to vector<16x16xf32>
    %121 = arith.mulf %119, %120 : vector<16x16xf32>
    %cst_58 = arith.constant dense<0xFF800000> : vector<16xf32>
    %122 = vector.multi_reduction <maximumf>, %121, %cst_58 [1] : vector<16x16xf32> to vector<16xf32>
    %123 = vector.shape_cast %122 : vector<16xf32> to vector<16x1xf32>
    %124 = vector.broadcast %123 : vector<16x1xf32> to vector<16x16xf32>
    %125 = arith.subf %121, %124 : vector<16x16xf32>
    %126 = math.exp %125 : vector<16x16xf32>
    %cst_59 = arith.constant dense<0.000000e+00> : vector<16xf32>
    %127 = vector.multi_reduction <add>, %126, %cst_59 [1] : vector<16x16xf32> to vector<16xf32>
    %128 = vector.shape_cast %127 : vector<16xf32> to vector<16x1xf32>
    %129 = tpu.reciprocal %128 {approx = true} : vector<16x1xf32> -> vector<16x1xf32>
    %130 = vector.broadcast %129 : vector<16x1xf32> to vector<16x16xf32>
    %131 = arith.mulf %126, %130 : vector<16x16xf32>
    %cst_60 = arith.constant dense<0.000000e+00> : vector<16x8xf32>
    %132 = tpu.matmul %131, %118, %cst_60 {dimension_numbers = #tpu.dot_dimension_numbers<[1], [0], [0], [1], [0, 0, 1, 1], [], []>} : vector<16x16xf32>, vector<16x8xf32>, vector<16x8xf32> -> vector<16x8xf32>
    %133 = tpu.concatenate %81, %98, %115, %132 in 1 : vector<16x8xf32>, vector<16x8xf32>, vector<16x8xf32>, vector<16x8xf32> -> vector<16x32xf32>
    %c0_61 = arith.constant 0 : index
    %c0_62 = arith.constant 0 : index
    %134 = vector.load %arg15[%c0_61, %c0_62] : memref<32x32xf32, #tpu.memory_space<vmem>>, vector<32x32xf32>
    %cst_63 = arith.constant dense<0.000000e+00> : vector<16x32xf32>
    %135 = tpu.matmul %133, %134, %cst_63 {dimension_numbers = #tpu.dot_dimension_numbers<[1], [0], [0], [1], [0, 0, 1, 1], [], []>} : vector<16x32xf32>, vector<32x32xf32>, vector<16x32xf32> -> vector<16x32xf32>
    %c0_64 = arith.constant 0 : index
    %c0_65 = arith.constant 0 : index
    %136 = vector.load %arg16[%c0_64, %c0_65] : memref<1x32xf32, #tpu.memory_space<vmem>>, vector<1x32xf32>
    %137 = vector.broadcast %136 : vector<1x32xf32> to vector<16x32xf32>
    %138 = arith.addf %135, %137 : vector<16x32xf32>
    %139 = arith.addf %56, %138 : vector<16x32xf32>
    %140 = vector.broadcast %47 : vector<1x32xf32> to vector<16x32xf32>
    %141 = arith.addf %139, %140 : vector<16x32xf32>
    %c0_66 = arith.constant 0 : index
    %c0_67 = arith.constant 0 : index
    %142 = vector.load %arg21[%c0_66, %c0_67] : memref<32x128xf32, #tpu.memory_space<vmem>>, vector<32x128xf32>
    %cst_68 = arith.constant dense<0.000000e+00> : vector<16x128xf32>
    %143 = tpu.matmul %141, %142, %cst_68 {dimension_numbers = #tpu.dot_dimension_numbers<[1], [0], [0], [1], [0, 0, 1, 1], [], []>} : vector<16x32xf32>, vector<32x128xf32>, vector<16x128xf32> -> vector<16x128xf32>
    %c0_69 = arith.constant 0 : index
    %c0_70 = arith.constant 0 : index
    %144 = vector.load %arg22[%c0_69, %c0_70] : memref<1x128xf32, #tpu.memory_space<vmem>>, vector<1x128xf32>
    %145 = vector.broadcast %144 : vector<1x128xf32> to vector<16x128xf32>
    %146 = arith.addf %143, %145 : vector<16x128xf32>
    %147 = arith.mulf %146, %146 : vector<16x128xf32>
    %148 = arith.mulf %146, %147 : vector<16x128xf32>
    %cst_71 = arith.constant 4.471500e-02 : f32
    %149 = vector.broadcast %cst_71 : f32 to vector<16x128xf32>
    %150 = arith.mulf %149, %148 : vector<16x128xf32>
    %151 = arith.addf %146, %150 : vector<16x128xf32>
    %cst_72 = arith.constant 0.797884583 : f32
    %152 = vector.broadcast %cst_72 : f32 to vector<16x128xf32>
    %153 = arith.mulf %152, %151 : vector<16x128xf32>
    %154 = math.tanh %153 : vector<16x128xf32>
    %cst_73 = arith.constant 1.000000e+00 : f32
    %155 = vector.broadcast %cst_73 : f32 to vector<16x128xf32>
    %156 = arith.addf %155, %154 : vector<16x128xf32>
    %cst_74 = arith.constant 5.000000e-01 : f32
    %157 = vector.broadcast %cst_74 : f32 to vector<16x128xf32>
    %158 = arith.mulf %157, %156 : vector<16x128xf32>
    %159 = arith.mulf %146, %158 : vector<16x128xf32>
    %c0_75 = arith.constant 0 : index
    %c0_76 = arith.constant 0 : index
    %160 = vector.load %arg23[%c0_75, %c0_76] : memref<128x32xf32, #tpu.memory_space<vmem>>, vector<128x32xf32>
    %cst_77 = arith.constant dense<0.000000e+00> : vector<16x32xf32>
    %161 = tpu.matmul %159, %160, %cst_77 {dimension_numbers = #tpu.dot_dimension_numbers<[1], [0], [0], [1], [0, 0, 1, 1], [], []>} : vector<16x128xf32>, vector<128x32xf32>, vector<16x32xf32> -> vector<16x32xf32>
    %c0_78 = arith.constant 0 : index
    %c0_79 = arith.constant 0 : index
    %162 = vector.load %arg24[%c0_78, %c0_79] : memref<1x32xf32, #tpu.memory_space<vmem>>, vector<1x32xf32>
    %163 = vector.broadcast %162 : vector<1x32xf32> to vector<16x32xf32>
    %164 = arith.addf %161, %163 : vector<16x32xf32>
    %165 = arith.addf %141, %164 : vector<16x32xf32>
    %c0_80 = arith.constant 0 : index
    %c0_81 = arith.constant 0 : index
    %166 = vector.load %arg25[%c0_80, %c0_81] : memref<32x4xf32, #tpu.memory_space<vmem>>, vector<32x4xf32>
    %cst_82 = arith.constant dense<0.000000e+00> : vector<16x4xf32>
    %167 = tpu.matmul %165, %166, %cst_82 {dimension_numbers = #tpu.dot_dimension_numbers<[1], [0], [0], [1], [0, 0, 1, 1], [], []>} : vector<16x32xf32>, vector<32x4xf32>, vector<16x4xf32> -> vector<16x4xf32>
    %c0_83 = arith.constant 0 : index
    %c0_84 = arith.constant 0 : index
    %168 = vector.load %arg26[%c0_83, %c0_84] : memref<1x4xf32, #tpu.memory_space<vmem>>, vector<1x4xf32>
    %169 = vector.broadcast %168 : vector<1x4xf32> to vector<16x4xf32>
    %170 = arith.addf %167, %169 : vector<16x4xf32>
    %c0_85 = arith.constant 0 : index
    %c0_86 = arith.constant 0 : index
    %c0_87 = arith.constant 0 : index
    %171 = vector.load %arg27[%c0_85, %c0_86, %c0_87] : memref<1x16x4xf32, #tpu.memory_space<vmem>>, vector<1x16x4xf32>
    %172 = vector.shape_cast %171 : vector<1x16x4xf32> to vector<16x4xf32>
    %173 = vector.shape_cast %170 : vector<16x4xf32> to vector<1x16x4xf32>
    tpu.vector_store %arg27[%c0_85, %c0_86, %c0_87], %173 {strides = array<i32>} : memref<1x16x4xf32, #tpu.memory_space<vmem>>, vector<1x16x4xf32>,
    return
  }
  func.func @transform_0(%arg0: i32) -> i32 {
    %c0_i32 = arith.constant 0 : i32
    %c0_i32_0 = arith.constant 0 : i32
    return %c0_i32 : i32
  }
  func.func @transform_1(%arg0: i32) -> i32 {
    %c0_i32 = arith.constant 0 : i32
    %c0_i32_0 = arith.constant 0 : i32
    return %c0_i32 : i32
  }
  func.func @transform_2(%arg0: i32) -> (i32, i32, i32) {
    %c0_i32 = arith.constant 0 : i32
    %c0_i32_0 = arith.constant 0 : i32
    %c0_i32_1 = arith.constant 0 : i32
    return %arg0, %c0_i32, %c0_i32_0 : i32, i32, i32
  }
  func.func @transform_3(%arg0: i32) -> (i32, i32, i32) {
    %c0_i32 = arith.constant 0 : i32
    %c0_i32_0 = arith.constant 0 : i32
    %c0_i32_1 = arith.constant 0 : i32
    return %arg0, %c0_i32, %c0_i32_0 : i32, i32, i32
  }
  func.func @transform_4(%arg0: i32) -> (i32, i32) {
    %c0_i32 = arith.constant 0 : i32
    %c0_i32_0 = arith.constant 0 : i32
    %c0_i32_1 = arith.constant 0 : i32
    return %c0_i32, %c0_i32_0 : i32, i32
  }
  func.func @transform_5(%arg0: i32) -> (i32, i32) {
    %c0_i32 = arith.constant 0 : i32
    %c0_i32_0 = arith.constant 0 : i32
    %c0_i32_1 = arith.constant 0 : i32
    return %c0_i32, %c0_i32_0 : i32, i32
  }
  func.func @transform_6(%arg0: i32) -> (i32, i32) {
    %c0_i32 = arith.constant 0 : i32
    %c0_i32_0 = arith.constant 0 : i32
    %c0_i32_1 = arith.constant 0 : i32
    return %c0_i32, %c0_i32_0 : i32, i32
  }
  func.func @transform_7(%arg0: i32) -> (i32, i32) {
    %c0_i32 = arith.constant 0 : i32
    %c0_i32_0 = arith.constant 0 : i32
    %c0_i32_1 = arith.constant 0 : i32
    return %c0_i32, %c0_i32_0 : i32, i32
  }
  func.func @transform_8(%arg0: i32) -> (i32, i32) {
    %c0_i32 = arith.constant 0 : i32
    %c0_i32_0 = arith.constant 0 : i32
    %c0_i32_1 = arith.constant 0 : i32
    return %c0_i32, %c0_i32_0 : i32, i32
  }
  func.func @transform_9(%arg0: i32) -> (i32, i32) {
    %c0_i32 = arith.constant 0 : i32
    %c0_i32_0 = arith.constant 0 : i32
    %c0_i32_1 = arith.constant 0 : i32
    return %c0_i32, %c0_i32_0 : i32, i32
  }
  func.func @transform_10(%arg0: i32) -> (i32, i32) {
    %c0_i32 = arith.constant 0 : i32
    %c0_i32_0 = arith.constant 0 : i32
    %c0_i32_1 = arith.constant 0 : i32
    return %c0_i32, %c0_i32_0 : i32, i32
  }
  func.func @transform_11(%arg0: i32) -> (i32, i32) {
    %c0_i32 = arith.constant 0 : i32
    %c0_i32_0 = arith.constant 0 : i32
    %c0_i32_1 = arith.constant 0 : i32
    return %c0_i32, %c0_i32_0 : i32, i32
  }
  func.func @transform_12(%arg0: i32) -> (i32, i32) {
    %c0_i32 = arith.constant 0 : i32
    %c0_i32_0 = arith.constant 0 : i32
    %c0_i32_1 = arith.constant 0 : i32
    return %c0_i32, %c0_i32_0 : i32, i32
  }
  func.func @transform_13(%arg0: i32) -> (i32, i32) {
    %c0_i32 = arith.constant 0 : i32
    %c0_i32_0 = arith.constant 0 : i32
    %c0_i32_1 = arith.constant 0 : i32
    return %c0_i32, %c0_i32_0 : i32, i32
  }
  func.func @transform_14(%arg0: i32) -> (i32, i32) {
    %c0_i32 = arith.constant 0 : i32
    %c0_i32_0 = arith.constant 0 : i32
    %c0_i32_1 = arith.constant 0 : i32
    return %c0_i32, %c0_i32_0 : i32, i32
  }
  func.func @transform_15(%arg0: i32) -> (i32, i32) {
    %c0_i32 = arith.constant 0 : i32
    %c0_i32_0 = arith.constant 0 : i32
    %c0_i32_1 = arith.constant 0 : i32
    return %c0_i32, %c0_i32_0 : i32, i32
  }
  func.func @transform_16(%arg0: i32) -> (i32, i32) {
    %c0_i32 = arith.constant 0 : i32
    %c0_i32_0 = arith.constant 0 : i32
    %c0_i32_1 = arith.constant 0 : i32
    return %c0_i32, %c0_i32_0 : i32, i32
  }
  func.func @transform_17(%arg0: i32) -> (i32, i32) {
    %c0_i32 = arith.constant 0 : i32
    %c0_i32_0 = arith.constant 0 : i32
    %c0_i32_1 = arith.constant 0 : i32
    return %c0_i32, %c0_i32_0 : i32, i32
  }
  func.func @transform_18(%arg0: i32) -> (i32, i32) {
    %c0_i32 = arith.constant 0 : i32
    %c0_i32_0 = arith.constant 0 : i32
    %c0_i32_1 = arith.constant 0 : i32
    return %c0_i32, %c0_i32_0 : i32, i32
  }
  func.func @transform_19(%arg0: i32) -> (i32, i32) {
    %c0_i32 = arith.constant 0 : i32
    %c0_i32_0 = arith.constant 0 : i32
    %c0_i32_1 = arith.constant 0 : i32
    return %c0_i32, %c0_i32_0 : i32, i32
  }
  func.func @transform_20(%arg0: i32) -> (i32, i32) {
    %c0_i32 = arith.constant 0 : i32
    %c0_i32_0 = arith.constant 0 : i32
    %c0_i32_1 = arith.constant 0 : i32
    return %c0_i32, %c0_i32_0 : i32, i32
  }
  func.func @transform_21(%arg0: i32) -> (i32, i32) {
    %c0_i32 = arith.constant 0 : i32
    %c0_i32_0 = arith.constant 0 : i32
    %c0_i32_1 = arith.constant 0 : i32
    return %c0_i32, %c0_i32_0 : i32, i32
  }
  func.func @transform_22(%arg0: i32) -> (i32, i32) {
    %c0_i32 = arith.constant 0 : i32
    %c0_i32_0 = arith.constant 0 : i32
    %c0_i32_1 = arith.constant 0 : i32
    return %c0_i32, %c0_i32_0 : i32, i32
  }
  func.func @transform_23(%arg0: i32) -> (i32, i32) {
    %c0_i32 = arith.constant 0 : i32
    %c0_i32_0 = arith.constant 0 : i32
    %c0_i32_1 = arith.constant 0 : i32
    return %c0_i32, %c0_i32_0 : i32, i32
  }
  func.func @transform_24(%arg0: i32) -> (i32, i32) {
    %c0_i32 = arith.constant 0 : i32
    %c0_i32_0 = arith.constant 0 : i32
    %c0_i32_1 = arith.constant 0 : i32
    return %c0_i32, %c0_i32_0 : i32, i32
  }
  func.func @transform_25(%arg0: i32) -> (i32, i32) {
    %c0_i32 = arith.constant 0 : i32
    %c0_i32_0 = arith.constant 0 : i32
    %c0_i32_1 = arith.constant 0 : i32
    return %c0_i32, %c0_i32_0 : i32, i32
  }
  func.func @transform_26(%arg0: i32) -> (i32, i32, i32) {
    %c0_i32 = arith.constant 0 : i32
    %c0_i32_0 = arith.constant 0 : i32
    %c0_i32_1 = arith.constant 0 : i32
    return %arg0, %c0_i32, %c0_i32_0 : i32, i32, i32
  }
}

</mosaic_0001>

<bundles_post_ra>
// kernel: sa_edm_forward.1
= control target key start
LH: loop header
LB: loop body
LE: loop exit
PB: predicated region body
PF: predicated region fallthrough
CT: control target
= control target key end

     0   :  { %s4537_s0 = inlined_call_operand.vmem [shape: f32[2], index: 0, kind: input, shape index: {}]   ;;  %s4538_s1 = inlined_call_operand.vmem [shape: f32[2], index: 1, kind: input, shape index: {}]   ;;  %s4539_s2 = inlined_call_operand.vmem [shape: f32[2,16,4], index: 2, kind: input, shape index: {}]   ;;  %s4540_s3 = inlined_call_operand.vmem [shape: f32[2,1,16], index: 3, kind: input, shape index: {}]   ;;  %s4541_s4 = inlined_call_operand.vmem [shape: f32[4,32], index: 4, kind: input, shape index: {}]   ;;  %s4542_s5 = inlined_call_operand.vmem [shape: f32[1,32], index: 5, kind: input, shape index: {}]   ;;  %s4543_s6 = inlined_call_operand.vmem [shape: f32[32,32], index: 6, kind: input, shape index: {}]   ;;  %s4544_s7 = inlined_call_operand.vmem [shape: f32[1,32], index: 7, kind: input, shape index: {}]   ;;  %s4545_s8 = inlined_call_operand.vmem [shape: f32[32,32], index: 8, kind: input, shape index: {}]   ;;  %s4546_s9 = inlined_call_operand.vmem [shape: f32[1,32], index: 9, kind: input, shape index: {}]   ;;  %s4547_s10 = inlined_call_operand.vmem [shape: f32[16,32], index: 10, kind: input, shape index: {}]   ;;  %s4548_s11 = inlined_call_operand.vmem [shape: f32[1,32], index: 11, kind: input, shape index: {}]   ;;  %s4549_s12 = inlined_call_operand.vmem [shape: f32[32,96], index: 12, kind: input, shape index: {}]   ;;  %s4550_s13 = inlined_call_operand.vmem [shape: f32[1,96], index: 13, kind: input, shape index: {}]   ;;  %s4551_s14 = inlined_call_operand.vmem [shape: f32[32,32], index: 14, kind: input, shape index: {}]   ;;  %s4552_s15 = inlined_call_operand.vmem [shape: f32[1,32], index: 15, kind: input, shape index: {}]   ;;  %s4553_s16 = inlined_call_operand.vmem [shape: f32[32,32], index: 16, kind: input, shape index: {}]   ;;  %s4554_s17 = inlined_call_operand.vmem [shape: f32[1,32], index: 17, kind: input, shape index: {}]   ;;  %s4555_s18 = inlined_call_operand.vmem [shape: f32[32,32], index: 18, kind: input, shape index: {}]   ;;  %s4556_s19 = inlined_call_operand.vmem [shape: f32[1,32], index: 19, kind: input, shape index: {}]   ;;  %s4557_s20 = inlined_call_operand.vmem [shape: f32[32,128], index: 20, kind: input, shape index: {}]   ;;  %s4558_s21 = inlined_call_operand.vmem [shape: f32[1,128], index: 21, kind: input, shape index: {}]   ;;  %s4559_s22 = inlined_call_operand.vmem [shape: f32[128,32], index: 22, kind: input, shape index: {}]   ;;  %s4560_s23 = inlined_call_operand.vmem [shape: f32[1,32], index: 23, kind: input, shape index: {}]   ;;  %s4561_s24 = inlined_call_operand.vmem [shape: f32[32,4], index: 24, kind: input, shape index: {}]   ;;  %s4562_s25 = inlined_call_operand.vmem [shape: f32[1,4], index: 25, kind: input, shape index: {}]   ;;  %s4563_s26 = inlined_call_operand.vmem [shape: f32[2,16,4], index: 26, kind: output, shape index: {}]  }
   0x1   :  { %4572 = sst [smem:[#allocation8_spill]] %s4537_s0 }
   0x2   :  { %4573 = sst [smem:[#allocation9_spill]] %s4538_s1 }
   0x3   :  { %4574 = sst [smem:[#allocation10_spill]] %s4539_s2 }
   0x4   :  { %4575 = sst [smem:[#allocation11_spill]] %s4540_s3 }
   0x5   :  { %4576 = sst [smem:[#allocation12_spill]] %s4541_s4 }
   0x6   :  { %4577 = sst [smem:[#allocation13_spill]] %s4542_s5 }
   0x7   :  { %4578 = sst [smem:[#allocation14_spill]] %s4543_s6 }
   0x8   :  { %4579 = sst [smem:[#allocation15_spill]] %s4544_s7 }
   0x9   :  { %4580 = sst [smem:[#allocation16_spill]] %s4545_s8 }
   0xa   :  { %4581 = sst [smem:[#allocation17_spill]] %s4546_s9 }
   0xb   :  { %4582 = sst [smem:[#allocation18_spill]] %s4547_s10 }
   0xc   :  { %31 = vsyncpa [#allocation3], 0 }
   0xd   :  { %32 = vsyncpa [#allocation5], 0  ;;  %s4048_s27 = smov 0  }
   0xe LB: > { %s4054_s3 = sadd.s32 4294967295, %s3886_s27   ;;  %p3192_p0 = scmp.ge.s32.totalorder %s3886_s27, 1  ;;  %s3886_s27 = sphi %s4048_s27, %s38_s27  }
   0xf   : > { %p625_p1 = scmp.lt.s32.totalorder %s3886_s27, 3  ;;  %s4583_s8 = sld [smem:[#allocation8_spill]] }
  0x10   : > { %p4567_p3 = scmp.eq.s32.totalorder %s4054_s3, 0  ;;  %s4585_s30 = sld [smem:[#allocation9_spill]] }
  0x11   : > { %p4061_p2 = pnand %p3192_p0, %p625_p1 }
  0x13   : > { %s4584_s29 = scalar_select %p4061_p2, 1, 0 }
  0x14   : > { %p3708_p4 = pneg %p4061_p2 }
  0x15   : > { %s638_s4 = sshll.u32 %s4583_s8, 4  ;;  %s639_s4 = int_to_ptr.vmem [resolvable:$true] %s638_s4 }
  0x16   : > { %s649_s2 = sshll.u32 %s4585_s30, 4  ;;  %p4073_p5 = pnand %p4567_p3, %p3708_p4  ;;  %s650_s2 = int_to_ptr.vmem [resolvable:$true] %s649_s2 }
  0x17   : > { %s3842_s10 = scalar_lea.vmem %s639_s4, 16  ;;  %p3850_p10 = scmp.lt.s32.totalorder %s639_s4, %s639_s4 }
  0x18   : > { %p3843_p6 = scmp.ne.s32.totalorder %s639_s4, %s3842_s10  ;;  %p3844_p7 = pneg %p4073_p5 }
  0x19   : > { %p3851_p11 = scmp.lt.s32.totalorder %s3842_s10, %s3842_s10 }
  0x1a   : > { %p3845_p8 = pnand %p3844_p7, %p3843_p6 }
  0x1b   : > { %p3852_p12 = por %p3851_p11, %p3850_p10 }
  0x1c   : > { %p3846_p9 = pneg %p3845_p8 }
  0x1e   : > { %p3853_p13 = pnand %p3852_p12, %p3846_p9 }
  0x20   : > { %3856 = shalt.err (!%p3853_p13)
}
  0x21   : > { %s3888_s6 = smov [#allocation2]   ;;  %s3857_s1 = scalar_lea.vmem %s650_s2, 16 }
  0x22   : > { %3711 = dma.vmem_to_smem (!%p4073_p5), %s639_s4, 16, %s3888_s6, [#allocation3]  }
  0x23   : > { %p3858_p0 = scmp.ne.s32.totalorder %s650_s2, %s3857_s1  ;;  %p3865_p3 = scmp.lt.s32.totalorder %s650_s2, %s650_s2 }
  0x24   : > { %p3866_p2 = scmp.lt.s32.totalorder %s3857_s1, %s3857_s1 }
  0x25   : > { %p3860_p1 = pnand %p3858_p0, %p3844_p7 }
  0x26   : > { %p3867_p6 = por %p3866_p2, %p3865_p3 }
  0x27   : > { %p3861_p4 = pneg %p3860_p1 }
  0x29   : > { %p3868_p8 = pnand %p3867_p6, %p3861_p4 }
  0x2b   : > { %3871 = shalt.err (!%p3868_p8)
}
  0x2c   : > { %s3889_s7 = smov [#allocation4]   ;;  %p4587_p9 = scmp.ne.s32.totalorder %s4584_s29, 0 }
  0x2d   : > { %3714 = dma.vmem_to_smem (!%p4073_p5), %s650_s2, 16, %s3889_s7, [#allocation5]  }
  0x2e   : > { %742 = sbr.rel (%p4587_p9) target bundleno = 4194 (0x1062), region = 124  ;;  %p4588_p10 = scmp.eq.s32.totalorder (!%p4587_p9), %s4054_s3, 0 }
  0x35   : > { %3877 = dma.done.wait (%p4588_p10), [#allocation3], 16   ;;  %p4589_p11 = pmov %p4588_p10 }
  0x36   : > { %p4590_p7 = pmov %p4588_p10 }
  0x37   : > { %3879 = vsyncadd (%p4589_p11), [#allocation3], 4294967280 }
  0x38   : > { %3881 = dma.done.wait (%p4590_p7), [#allocation5], 16   ;;  %p4591_p2 = pmov %p4590_p7 }
  0x3a   : > { %3883 = vsyncadd (%p4591_p2), [#allocation5], 4294967280 }
  0x3b   : > { %752 = sfence }
  0x3c   : > { %v833_v0 = vlaneseq  ;;  %s4592_s4 = sld [smem:[#allocation14_spill]]  ;;  %v3890_v4 = vmov 0.0|0.0   ;;  %v3891_v26 = vmov 683565275   ;;  %v3892_v28 = vmov 2475754826  }
  0x3d   : > { %3561 = vmatprep.subr.bf16.mxu1 %v3890_v4  ;;  %3582 = vmatprep.subr.bf16.mxu0 %v3890_v4  ;;  %s839_s10 = sld [smem:[#allocation2 + %s4054_s3]]  ;;  %v3893_v30 = vmov 2131351028   ;;  %v3894_v32 = vmov 2102212464   ;;  %vm3897_vm9 = vmmov 0  }
  0x3e   : > { %v834_v1 = vand.u32 127, %v833_v0  ;;  %v3895_v34 = vmov 920167782   ;;  %v3896_v41 = vmov 1326507024   ;;  %s4569_s6 = smov 16  }
  0x3f   : > { %s4593_s28 = sld [smem:[#allocation16_spill]]  ;;  %s4594_s7 = sld [smem:[#allocation15_spill]] }
  0x40   : > { %v835_v8 = vcvt.s32.f32 %v834_v1  ;;  %s1055_s5 = sld [smem:[#allocation4 + %s4054_s3]]  ;;  %p820_p3 = scmp.lt.s32.totalorder %s4054_s3, 1 }
  0x41   : > { %s4595_s0 = sld [smem:[#allocation18_spill]]  ;;  %s4598_s2 = sld [smem:[#allocation17_spill]] }
  0x42   : > { %v1270_v2 = vld [vmem:[%s4592_s4] sm:$0xff]  ;;  %v1271_v3 = vld [vmem:[%s4592_s4 + $0x8] sm:$0xff]  ;;  %v1272_v6 = vld [vmem:[%s4592_s4 + $0x10] sm:$0xff]  ;;  %v836_v10 = vmul.f32 -0.6140227, %v835_v8  ;;  %s4606_s3 = smov (!%p820_p3, %s4054_s3), 1 }
  0x43   : > { %v3562_v5 = vpack.c.bf16 %v1271_v3, %v1270_v2  ;;  %v1273_v7 = vld [vmem:[%s4592_s4 + $0x18] sm:$0xff]  ;;  %v840_v12 = vstv %s839_s10  ;;  %s4596_s10 = sld [smem:[#allocation11_spill]]  ;;  %s4599_s29 = sld [smem:[#allocation10_spill]] }
  0x44   : > { %v3565_v9 = vpack.c.bf16 %v1273_v7, %v1272_v6  ;;  %v837_v11 = vmul.f32 1.442695, %v836_v10  ;;  %s3900_s30 = smov 120   ;;  %s3905_s8 = smov 56  }
  0x45   : > { %3563 = vmatpush3.bf16.msra.mxu1 %v3562_v5  ;;  %s3908_s9 = smov 104  }
  0x46   : > { %3564 = vmatprep.subr.bf16.mxu1 %v3890_v4  ;;  %3792 = vpow2.f32 %v837_v11 }
  0x49   : > { %3566 = vmatpush3.bf16.msra.mxu1 %v3565_v9  ;;  %s827_s1 = scalar_lea.vmem %s4596_s10, %s4606_s3  ;;  %s3902_s10 = smov 88  }
  0x4a   : > { %3567 = vmatprep.subr.bf16.mxu1 %v3890_v4 }
  0x50   : > { %v4111_v13 = vpop.eup %3792 }
  0x51   : > { %v4114_v14 = vmul.f32 %v4111_v13, %v840_v12 }
  0x53   : > { %v845_v15 = vand.u32 2139095040, %v4114_v14  ;;  %v842_v17 = vand.u32 2147483647, %v4114_v14  ;;  %vm844_vm7 = vcmp.lt.s32.totalorder %v4114_v14, 0 }
  0x55   : > { %v846_v16 = vshrl.u32 %v845_v15, 23  ;;  %v849_v20 = vand.u32 8388607, %v842_v17  ;;  %vm843_vm8 = vcmp.le.f32.partialorder %v842_v17, 0.7853982 }
  0x57   : > { %v3203_v18 = vadd.s32 4294967169, %v846_v16  ;;  %v850_v23 = vor.u32 8388608, %v849_v20 }
  0x59   : > { %v852_v19 = vadd.s32 1, %v3203_v18  ;;  %v890_v43 = vshll.u32 %v850_v23, 8 }
  0x5b   : > { %vm853_vm0 = vcmp.gt.s32.totalorder %v852_v19, 0 }
  0x5c   : > { %v854_v21 = vsel %vm853_vm0, %v852_v19, 0  ;;  %vm934_vm0 = vweird.f32 %v4114_v14 }
  0x5d   : > { %v856_v22 = vand.u32 31, %v854_v21  ;;  %v855_v24 = vshrl.u32 %v854_v21, 5 }
  0x5f   : > { %v857_v25 = vsub.s32 32, %v856_v22  ;;  %v859_v27 = vshll.u32 %v3891_v26, %v856_v22  ;;  %v862_v29 = vshll.u32 %v3892_v28, %v856_v22  ;;  %v865_v31 = vshll.u32 %v3893_v30, %v856_v22 }
  0x60   : > { %v868_v33 = vshll.u32 %v3894_v32, %v856_v22  ;;  %v871_v35 = vshll.u32 %v3895_v34, %v856_v22  ;;  %vm874_vm1 = vcmp.lt.s32.totalorder %v855_v24, 1  ;;  %vm877_vm2 = vcmp.lt.s32.totalorder %v855_v24, 4 }
  0x61   : > { %v858_v36 = vshrl.u32 %v3891_v26, %v857_v25  ;;  %v860_v37 = vshrl.u32 %v3892_v28, %v857_v25  ;;  %v863_v38 = vshrl.u32 %v3893_v30, %v857_v25  ;;  %v866_v39 = vshrl.u32 %v3894_v32, %v857_v25 }
  0x62   : > { %v869_v40 = vshrl.u32 %v3895_v34, %v857_v25  ;;  %v872_v42 = vshrl.u32 %v3896_v41, %v857_v25  ;;  %vm875_vm3 = vcmp.lt.s32.totalorder %v855_v24, 2  ;;  %vm876_vm4 = vcmp.lt.s32.totalorder %v855_v24, 3 }
  0x63   : > { %v861_v44 = vor.u32 %v860_v37, %v859_v27  ;;  %v864_v45 = vor.u32 %v863_v38, %v862_v29  ;;  %v867_v46 = vor.u32 %v866_v39, %v865_v31 }
  0x64   : > { %v870_v47 = vor.u32 %v869_v40, %v868_v33  ;;  %v873_v48 = vor.u32 %v872_v42, %v871_v35 }
  0x65   : > { %v878_v49 = vsel %vm874_vm1, %v858_v36, %v861_v44  ;;  %v879_v50 = vsel %vm877_vm2, %v867_v46, 2102212464  ;;  %v882_v51 = vsel %vm874_vm1, %v861_v44, %v864_v45  ;;  %v886_v52 = vsel %vm874_vm1, %v864_v45, %v867_v46 }
  0x66   : > { %v880_v53 = vsel %vm876_vm4, %v864_v45, %v879_v50  ;;  %v883_v54 = vsel %vm877_vm2, %v870_v47, 920167782  ;;  %v887_v55 = vsel %vm877_vm2, %v873_v48, 1326507024  ;;  %v3898_v44 = vmov 0.0  }
  0x67   : > { %v884_v56 = vsel %vm876_vm4, %v867_v46, %v883_v54  ;;  %v888_v57 = vsel %vm876_vm4, %v870_v47, %v887_v55  ;;  %v881_v58 = vsel %vm875_vm3, %v878_v49, %v880_v53  ;;  %3378 = vmatprep.mubr.msk.f32.mxu1 %vm3897_vm9, %v3898_v44  ;;  %3418 = vmatprep.mubr.msk.f32.mxu0 %vm3897_vm9, %v3898_v44  ;;  %vm1053_vm1 = vcmask 130048  }
  0x68   : > { %v885_v59 = vsel %vm875_vm3, %v882_v51, %v884_v56  ;;  %v889_v60 = vsel %vm875_vm3, %v886_v52, %v888_v57  ;;  %v897_v2 = vmul.u32 %v890_v43, %v881_v58  ;;  %vm1275_vm2 = vcmask 261120  }
  0x69   : > { %v4131_v61 = vmul.u32.u64.low %v890_v43, %v889_v60  ;;  %v4132_v62 = vmul.u32.u64.high %v890_v43, %v889_v60, %v4131_v61  ;;  %v4134_v63 = vmul.u32.u64.low %v890_v43, %v885_v59  ;;  %v4135_v1 = vmul.u32.u64.high %v890_v43, %v885_v59, %v4134_v63  ;;  %v1357_v60 = vld [vmem:[%s4593_s28 + $0x8] sm:$0xff] }
  0x6b   : > { %vm899_vm5 = vc.u32 %v4132_v62, %v4134_v63  ;;  %v900_v3 = vadd.s32 1, %v4135_v1  ;;  %v898_v18 = vadd.s32 %v4134_v63, %v4132_v62  ;;  %v1358_v62 = vld [vmem:[%s4593_s28 + $0x10] sm:$0xff]  ;;  %v1359_v63 = vld [vmem:[%s4593_s28 + $0x18] sm:$0xff] }
  0x6d   : > { %v901_v5 = vsel %vm899_vm5, %v900_v3, %v4135_v1  ;;  %v3571_v1 = vpack.c.bf16 %v1359_v63, %v1358_v62 }
  0x6e   : > { %v902_v6 = vadd.s32 %v901_v5, %v897_v2  ;;  %v1056_v2 = vstv %s1055_s5  ;;  %s4571_s5 = sshll.u32 %s4606_s3, 4 }
  0x6f   : > { %v4171_v3 = vmul.f32 %v4111_v13, %v1056_v2 }
  0x70   : > { %v903_v7 = vadd.s32 536870912, %v902_v6 }
  0x71   : > { %v1061_v5 = vand.u32 2139095040, %v4171_v3 }
  0x72   : > { %v904_v8 = vshrl.u32 %v903_v7, 30  ;;  %v1058_v7 = vand.u32 2147483647, %v4171_v3 }
  0x74   : > { %v905_v9 = vshll.u32 %v904_v8, 30  ;;  %v928_v36 = vsub.s32 4, %v904_v8 }
  0x76   : > { %v906_v10 = vsub.s32 %v902_v6, %v905_v9  ;;  %v929_v39 = vsel %vm844_vm7, %v928_v36, %v904_v8  ;;  %v1062_v6 = vshrl.u32 %v1061_v5, 23 }
  0x77   : > { %v931_v42 = vsel %vm843_vm8, 0, %v929_v39 }
  0x78   : > { %v908_v11 = vsub.s32 0, %v906_v10  ;;  %v935_v43 = vadd.s32 3, %v931_v42  ;;  %v1039_v46 = vand.u32 3, %v931_v42  ;;  %v3211_v8 = vadd.s32 4294967169, %v1062_v6 }
  0x7a   : > { %v3204_v12 = vmin.u32 %v908_v11, %v906_v10  ;;  %v936_v45 = vand.u32 3, %v935_v43  ;;  %vm1044_vm11 = vcmp.eq.s32.totalorder %v1039_v46, 2  ;;  %vm1041_vm13 = vcmp.eq.s32.totalorder %v1039_v46, 0 }
  0x7b   : > { %vm1040_vm15 = vcmp.lt.s32.totalorder %v1039_v46, 2  ;;  %v1068_v9 = vadd.s32 1, %v3211_v8 }
  0x7c   : > { %v910_v15 = vclz %v3204_v12  ;;  %vm941_vm10 = vcmp.eq.s32.totalorder %v936_v45, 2  ;;  %vm938_vm12 = vcmp.eq.s32.totalorder %v936_v45, 0  ;;  %vm937_vm14 = vcmp.lt.s32.totalorder %v936_v45, 2 }
  0x7d   : > { %vm1069_vm3 = vcmp.gt.s32.totalorder %v1068_v9, 0 }
  0x7e   : > { %v3205_v16 = vadd.s32 4294967294, %v910_v15  ;;  %v1070_v11 = vsel %vm1069_vm3, %v1068_v9, 0 }
  0x7f   : > { %v1072_v12 = vand.u32 31, %v1070_v11 }
  0x80   : > { %vm3206_vm6 = vcmp.lt.s32.totalorder %v3205_v16, 0 }
  0x81   : > { %v913_v19 = vsel %vm3206_vm6, 0, %v3205_v16  ;;  %v1071_v16 = vshrl.u32 %v1070_v11, 5  ;;  %v1078_v13 = vshll.u32 %v3892_v28, %v1072_v12 }
  0x82   : > { %v914_v20 = vsub.s32 32, %v913_v19  ;;  %v915_v21 = vshll.u32 %v906_v10, %v913_v19  ;;  %v918_v22 = vsub.s32 4294967266, %v913_v19  ;;  %v1065_v10 = vand.u32 8388607, %v1058_v7 }
  0x83   : > { %v1075_v19 = vshll.u32 %v3891_v26, %v1072_v12  ;;  %vm1090_vm4 = vcmp.lt.s32.totalorder %v1071_v16, 1  ;;  %vm1093_vm5 = vcmp.lt.s32.totalorder %v1071_v16, 4  ;;  %vm1091_vm6 = vcmp.lt.s32.totalorder %v1071_v16, 2 }
  0x84   : > { %v916_v23 = vshrl.u32 %v898_v18, %v914_v20  ;;  %v919_v24 = vadd.s32 127, %v918_v22  ;;  %v1066_v15 = vor.u32 8388608, %v1065_v10  ;;  %v1073_v18 = vsub.s32 32, %v1072_v12 }
  0x85   : > { %v1081_v20 = vshll.u32 %v3893_v30, %v1072_v12  ;;  %v1087_v22 = vshll.u32 %v3895_v34, %v1072_v12 }
  0x86   : > { %v917_v25 = vor.u32 %v916_v23, %v915_v21  ;;  %v920_v27 = vshll.u32 %v919_v24, 23  ;;  %v1084_v21 = vshll.u32 %v3894_v32, %v1072_v12  ;;  %v1074_v23 = vshrl.u32 %v3891_v26, %v1073_v18 }
  0x87   : > { %v1076_v24 = vshrl.u32 %v3892_v28, %v1073_v18 }
  0x88   : > { %v921_v29 = vor.u32 4788187, %v920_v27  ;;  %v924_v31 = vcvt.s32.f32 %v917_v25  ;;  %v1079_v25 = vshrl.u32 %v3893_v30, %v1073_v18  ;;  %v1082_v27 = vshrl.u32 %v3894_v32, %v1073_v18 }
  0x8a   : > { %v922_v33 = vand.u32 2147483647, %v921_v29  ;;  %v1085_v29 = vshrl.u32 %v3895_v34, %v1073_v18  ;;  %v1080_v36 = vor.u32 %v1079_v25, %v1078_v13 }
  0x8c   : > { %v925_v35 = vmul.f32 %v924_v31, %v922_v33  ;;  %v1088_v31 = vshrl.u32 %v3896_v41, %v1073_v18  ;;  %v1106_v33 = vshll.u32 %v1066_v15, 8 }
  0x8e   : > { %v926_v37 = vxor.u32 2147483648, %v925_v35  ;;  %v1089_v39 = vor.u32 %v1088_v31, %v1087_v22 }
  0x90   : > { %v927_v38 = vsel %vm844_vm7, %v926_v37, %v925_v35  ;;  %v1077_v35 = vor.u32 %v1076_v24, %v1075_v19  ;;  %v1083_v37 = vor.u32 %v1082_v27, %v1081_v20  ;;  %vm1092_vm7 = vcmp.lt.s32.totalorder %v1071_v16, 3 }
  0x91   : > { %v930_v40 = vsel %vm843_vm8, %v4114_v14, %v927_v38  ;;  %v1356_v14 = vld [vmem:[%s4593_s28] sm:$0xff]  ;;  %v1086_v38 = vor.u32 %v1085_v29, %v1084_v21  ;;  %v1103_v43 = vsel %vm1093_vm5, %v1089_v39, 1326507024 }
  0x92   : > { %3794 = vcosq.f32 %v930_v40  ;;  %v3568_v61 = vpack.c.bf16 %v1357_v60, %v1356_v14  ;;  %v1094_v26 = vsel %vm1090_vm4, %v1074_v23, %v1077_v35  ;;  %v1095_v28 = vsel %vm1093_vm5, %v1083_v37, 2102212464 }
  0x93   : > { %3796 = vsinq.f32 %v930_v40  ;;  %v1098_v40 = vsel %vm1090_vm4, %v1077_v35, %v1080_v36  ;;  %v1102_v30 = vsel %vm1090_vm4, %v1080_v36, %v1083_v37  ;;  %v1096_v42 = vsel %vm1092_vm7, %v1080_v36, %v1095_v28 }
  0x94   : > { %v1099_v32 = vsel %vm1093_vm5, %v1086_v38, 920167782  ;;  %v1104_v45 = vsel %vm1092_vm7, %v1086_v38, %v1103_v43  ;;  %v1097_v41 = vsel %vm1091_vm6, %v1094_v26, %v1096_v42  ;;  %vm1150_vm5 = vweird.f32 %v4171_v3 }
  0x95   : > { %v1100_v34 = vsel %vm1092_vm7, %v1083_v37, %v1099_v32  ;;  %vm1868_vm7 = vcmask 64512  }
  0x96   : > { %v1101_v46 = vsel %vm1091_vm6, %v1098_v40, %v1100_v34  ;;  %v1274_v40 = vld [vmem:[%s4594_s7] sm:$0x1]  ;;  %s3904_s7 = smov 80  }
  0x9c   : > { %v3795_v17 = vpop.eup %3794 }
  0x9d   : > { %v3797_v47 = vpop.eup %3796  ;;  %v942_v48 = vxor.u32 2147483648, %v3795_v17 }
  0x9e   : > { %v939_v49 = vxor.u32 2147483648, %v3797_v47 }
  0x9f   : > { %v1046_v50 = vsel %vm1044_vm11, %v942_v48, %v3797_v47  ;;  %v943_v51 = vsel %vm941_vm10, %v942_v48, %v3797_v47  ;;  %vm1060_vm11 = vcmp.lt.s32.totalorder %v4171_v3, 0 }
  0xa0   : > { %v1043_v52 = vsel %vm1041_vm13, %v3795_v17, %v939_v49  ;;  %v940_v53 = vsel %vm938_vm12, %v3795_v17, %v939_v49  ;;  %v1105_v17 = vsel %vm1091_vm6, %v1102_v30, %v1104_v45  ;;  %vm1059_vm12 = vcmp.le.f32.partialorder %v1058_v7, 0.7853982  ;;  %v1436_v45 = vld [vmem:[%s4595_s0] sm:$0xff] }
  0xa1   : > { %v1047_v54 = vsel %vm1040_vm15, %v1043_v52, %v1046_v50  ;;  %v944_v55 = vsel %vm937_vm14, %v940_v53, %v943_v51  ;;  %v4188_v47 = vmul.u32.u64.low %v1106_v33, %v1105_v17  ;;  %v4189_v48 = vmul.u32.u64.high %v1106_v33, %v1105_v17, %v4188_v47 }
  0xa2   : > { %v1048_v56 = vsel %vm934_vm0, nan, %v1047_v54  ;;  %v945_v57 = vsel %vm934_vm0, nan, %v944_v55  ;;  %v4191_v49 = vmul.u32.u64.low %v1106_v33, %v1101_v46  ;;  %v4192_v50 = vmul.u32.u64.high %v1106_v33, %v1101_v46, %v4191_v49 }
  0xa3   : > { %1050 = vrot.lane.b32.xlu0 %v1048_v56, %s4569_s6  ;;  %v1113_v51 = vmul.u32 %v1106_v33, %v1097_v41  ;;  %v1437_v41 = vld [vmem:[%s4595_s0 + $0x8] sm:$0xff]  ;;  %vm1685_vm6 = vcmask 1043456  }
  0xa4   : > { %vm1115_vm8 = vc.u32 %v4189_v48, %v4191_v49  ;;  %v1116_v52 = vadd.s32 1, %v4192_v50  ;;  %v1114_v62 = vadd.s32 %v4191_v49, %v4189_v48  ;;  %v3574_v17 = vpack.c.bf16 %v1437_v41, %v1436_v45  ;;  %v1512_v48 = vld [vmem:[%s4553_s16] sm:$0xff]  ;;  %v1513_v49 = vld [vmem:[%s4553_s16 + $0x8] sm:$0xff] }
  0xa6   : > { %v1117_v53 = vsel %vm1115_vm8, %v1116_v52, %v4192_v50  ;;  %v1435_v50 = vld [vmem:[%s827_s1] sm:$0x1]  ;;  %v1514_v52 = vld [vmem:[%s4553_s16 + $0x10] sm:$0xff]  ;;  %s4597_s1 = sld [smem:[#allocation12_spill]]  ;;  %vm4329_vm8 = vmpackc.low %vm1868_vm7, %vm1868_vm7 }
  0xa7   : > { %v1118_v54 = vadd.s32 %v1117_v53, %v1113_v51  ;;  %v3577_v51 = vpack.c.bf16 %v1513_v49, %v1512_v48  ;;  %v1515_v53 = vld [vmem:[%s4553_s16 + $0x18] sm:$0xff] }
  0xa9   : > { %v1119_v55 = vadd.s32 536870912, %v1118_v54 }
  0xab   : > { %v1120_v56 = vshrl.u32 %v1119_v55, 30 }
  0xac   : > { %v1670_v55 = vld [vmem:[%s4597_s1] sm:$0xf]  ;;  %s3903_s1 = smov 64  }
  0xad   : > { %v1144_v18 = vsub.s32 4, %v1120_v56 }
  0xaf   : > { %v1145_v20 = vsel %vm1060_vm11, %v1144_v18, %v1120_v56  ;;  %v4282_v18 = vshrl.u32 %v833_v0, 7 }
  0xb0   : > { %v1147_v22 = vsel %vm1059_vm12, 0, %v1145_v20  ;;  %v1773_v20 = vld [vmem:[%s4549_s12 + $0x18] sm:$0xff] }
  0xb1   : > { %v1151_v23 = vadd.s32 3, %v1147_v22  ;;  %v1255_v25 = vand.u32 3, %v1147_v22 }
  0xb3   : > { %v1152_v24 = vand.u32 3, %v1151_v23  ;;  %vm1260_vm14 = vcmp.eq.s32.totalorder %v1255_v25, 2  ;;  %vm1257_vm0 = vcmp.eq.s32.totalorder %v1255_v25, 0  ;;  %vm1256_vm4 = vcmp.lt.s32.totalorder %v1255_v25, 2 }
  0xb5   : > { %vm1157_vm13 = vcmp.eq.s32.totalorder %v1152_v24, 2  ;;  %vm1154_vm15 = vcmp.eq.s32.totalorder %v1152_v24, 0  ;;  %vm1153_vm3 = vcmp.lt.s32.totalorder %v1152_v24, 2  ;;  %v1766_v24 = vsub.s32 0, %v4282_v18  ;;  %v2911_v18 = vld [vmem:[%s4559_s22 + $0x8] sm:$0xff] }
 0x115   : > { %v1051_v58 = vpop.permute.xlu0 %1050 }
 0x116   : > { %v1054_v59 = vsel %vm1053_vm1, %v945_v57, %v1051_v58  ;;  %v1121_v57 = vshll.u32 %v1120_v56, 30  ;;  %v1591_v56 = vld [vmem:[%s4555_s18 + $0x8] sm:$0xff] }
 0x117   : > { %3379 = vmatmul.mubr.msk.f32.vlgmr.msra.gmra.mrb[0].mxu1 %vm1275_vm2, %v1054_v59 }
 0x118   : > { %3389 = vmatprep.mubr.msk.f32.mxu1 %vm3897_vm9, %v3898_v44  ;;  %3569 = vmatpush3.bf16.msra.mxu1 %v3568_v61  ;;  %v1122_v58 = vsub.s32 %v1118_v54, %v1121_v57  ;;  %v3580_v54 = vpack.c.bf16 %v1515_v53, %v1514_v52 }
 0x119   : > { %3570 = vmatprep.subr.bf16.mxu1 %v3890_v4 }
 0x11a   : > { %v1124_v59 = vsub.s32 0, %v1122_v58 }
 0x11c   : > { %3572 = vmatpush3.bf16.msra.mxu1 %v3571_v1  ;;  %v3212_v14 = vmin.u32 %v1124_v59, %v1122_v58  ;;  %v1360_v59 = vld [vmem:[%s4598_s2] sm:$0x1]  ;;  %s3901_s2 = smov 96  }
 0x11d   : > { %3573 = vmatprep.subr.bf16.mxu1 %v3890_v4 }
 0x11e   : > { %v1126_v60 = vclz %v3212_v14 }
 0x120   : > { %v3213_v61 = vadd.s32 4294967294, %v1126_v60 }
 0x122   : > { %vm3214_vm10 = vcmp.lt.s32.totalorder %v3213_v61, 0 }
 0x123   : > { %v1129_v63 = vsel %vm3214_vm10, 0, %v3213_v61  ;;  %vm2697_vm10 = vcmask 195584  }
 0x124   : > { %v1130_v1 = vsub.s32 32, %v1129_v63  ;;  %v1131_v2 = vshll.u32 %v1122_v58, %v1129_v63  ;;  %v1134_v5 = vsub.s32 4294967266, %v1129_v63  ;;  %v1438_v63 = vld [vmem:[%s4548_s11] sm:$0x1] }
 0x126   : > { %v1132_v6 = vshrl.u32 %v1114_v62, %v1130_v1  ;;  %v1135_v8 = vadd.s32 127, %v1134_v5 }
 0x128   : > { %v1133_v9 = vor.u32 %v1132_v6, %v1131_v2  ;;  %v1136_v10 = vshll.u32 %v1135_v8, 23 }
 0x12a   : > { %v1137_v11 = vor.u32 4788187, %v1136_v10  ;;  %v1140_v12 = vcvt.s32.f32 %v1133_v9  ;;  %v1592_v9 = vld [vmem:[%s4555_s18 + $0x10] sm:$0xff]  ;;  %v1593_v10 = vld [vmem:[%s4555_s18 + $0x18] sm:$0xff] }
 0x12c   : > { %v1138_v15 = vand.u32 2147483647, %v1137_v11  ;;  %v3586_v11 = vpack.c.bf16 %v1593_v10, %v1592_v9 }
 0x12e   : > { %v1141_v16 = vmul.f32 %v1140_v12, %v1138_v15  ;;  %v1770_v12 = vld [vmem:[%s4549_s12] sm:$0xff]  ;;  %v1771_v15 = vld [vmem:[%s4549_s12 + $0x8] sm:$0xff] }
 0x130   : > { %v1142_v19 = vxor.u32 2147483648, %v1141_v16 }
 0x132   : > { %v1143_v13 = vsel %vm1060_vm11, %v1142_v19, %v1141_v16  ;;  %v3588_v16 = vpack.c.bf16 %v1771_v15, %v1770_v12  ;;  %v1516_v19 = vld [vmem:[%s4554_s17] sm:$0x1] }
 0x133   : > { %v1146_v21 = vsel %vm1059_vm12, %v4171_v3, %v1143_v13  ;;  %v1772_v13 = vld [vmem:[%s4549_s12 + $0x10] sm:$0xff] }
 0x134   : > { %3798 = vcosq.f32 %v1146_v21  ;;  %v3592_v25 = vpack.c.bf16 %v1773_v20, %v1772_v13 }
 0x135   : > { %3800 = vsinq.f32 %v1146_v21 }
 0x13e   : > { %v3799_v27 = vpop.eup %3798 }
 0x13f   : > { %v3801_v29 = vpop.eup %3800  ;;  %v1158_v31 = vxor.u32 2147483648, %v3799_v27 }
 0x140   : > { %v1155_v7 = vxor.u32 2147483648, %v3801_v29 }
 0x141   : > { %v1159_v33 = vsel %vm1157_vm13, %v1158_v31, %v3801_v29  ;;  %v1262_v35 = vsel %vm1260_vm14, %v1158_v31, %v3801_v29 }
 0x142   : > { %v1156_v36 = vsel %vm1154_vm15, %v3799_v27, %v1155_v7  ;;  %v1259_v37 = vsel %vm1257_vm0, %v3799_v27, %v1155_v7 }
 0x143   : > { %v1160_v38 = vsel %vm1153_vm3, %v1156_v36, %v1159_v33  ;;  %v1263_v39 = vsel %vm1256_vm4, %v1259_v37, %v1262_v35 }
 0x144   : > { %v1161_v26 = vsel %vm1150_vm5, nan, %v1160_v38  ;;  %v1264_v28 = vsel %vm1150_vm5, nan, %v1263_v39  ;;  %v3229_v39 = vld [vmem:[%s4550_s13] ss:$0 sm:$0xff] }
 0x145   : > { %1266 = vrot.lane.b32.xlu0 %v1264_v28, %s4569_s6  ;;  %s824_s6 = scalar_lea.vmem %s4599_s29, %s4571_s5  ;;  %s4600_s29 = sld [smem:[#allocation13_spill]] }
 0x146   : > { %v1668_v6 = vld [vmem:[%s824_s6] sm:$0xff]  ;;  %v1669_v8 = vld [vmem:[%s824_s6 + $0x8] sm:$0xff]  ;;  %s3907_s6 = smov 72  }
 0x14b   : > { %v3225_v0 = vld [vmem:[%s4600_s29] ss:$0 sm:$0xff]  ;;  %s3906_s29 = smov 112  }
 0x1b7   : > { %v1267_v58 = vpop.permute.xlu0 %1266 }
 0x1b8   : > { %v1269_v60 = vsel %vm1053_vm1, %v1161_v26, %v1267_v58 }
 0x1ea   : > { %v1345_v30 = vpop.f32.mrb[0].mxu1 }
 0x1eb   : > { %v1346_v42 = vadd.f32 %v1345_v30, %v1274_v40  ;;  %v3380_v32 = vpop.f32.mrb[1].mxu1 }
 0x1ed   : > { %v3220_v3 = vmul.f32 -1.442695, %v1346_v42 }
 0x1ef   : > { %3802 = vpow2.f32 %v3220_v3 }
 0x1f9   : > { %v3803_v43 = vpop.eup %3802 }
 0x1fa   : > { %v1352_v34 = vadd.f32 1.0, %v3803_v43 }
 0x1fc   : > { %3804 = vrcp.f32 %v1352_v34 }
 0x206   : > { %v3805_v46 = vpop.eup %3804 }
 0x207   : > { %v1355_v47 = vmul.f32 %v3805_v46, %v1346_v42 }
 0x209   : > { %3390 = vmatmul.mubr.msk.f32.vlgmr.msra.gmra.mrb[2].mxu1 %vm1275_vm2, %v1355_v47 }
 0x20a   : > { %3575 = vmatpush3.bf16.msra.mxu1 %v3574_v17  ;;  %3396 = vmatprep.mubr.msk.f32.mxu1 %vm3897_vm9, %v3898_v44 }
 0x20b   : > { %3576 = vmatprep.subr.bf16.mxu1 %v3890_v4 }
 0x20d   : > { %3397 = vmatmul.mubr.msk.f32.vlgmr.msra.gmra.mrb[4].mxu1 %vm1053_vm1, %v1435_v50 }
 0x20e   : > { %3578 = vmatpush3.bf16.msra.mxu1 %v3577_v51  ;;  %3407 = vmatprep.mubr.msk.f32.mxu1 %vm3897_vm9, %v3898_v44  ;;  %v1590_v44 = vld [vmem:[%s4555_s18] sm:$0xff]  ;;  %vm1678_vm9 = vcmask 31744  }
 0x20f   : > { %3579 = vmatprep.subr.bf16.mxu1 %v3890_v4  ;;  %v3583_v57 = vpack.c.bf16 %v1591_v56, %v1590_v44 }
 0x211   : > { %3584 = vmatpush3.bf16.msra.mxu0 %v3583_v57 }
 0x212   : > { %3581 = vmatpush3.bf16.msra.mxu1 %v3580_v54  ;;  %3585 = vmatprep.subr.bf16.mxu0 %v3890_v4 }
 0x213   : > { %3421 = vmatprep.subr.msk.mxu1 %vm1685_vm6, %v1670_v55 }
 0x215   : > { %3587 = vmatpush3.bf16.msra.mxu0 %v3586_v11 }
 0x216   : > { %3589 = vmatprep.subr.bf16.mxu0 %v3588_v16 }
 0x2dc   : > { %v1430_v14 = vpop.f32.mrb[2].mxu1 }
 0x2dd   : > { %v1431_v61 = vadd.f32 %v1430_v14, %v1360_v59  ;;  %v3391_v62 = vpop.f32.mrb[3].mxu1 }
 0x2df   : > { %v1434_v4 = vadd.f32 %v1431_v61, %v1269_v60 }
 0x2e0   : > { %v1508_v1 = vpop.f32.mrb[4].mxu1 }
 0x2e1   : > { %v1509_v2 = vadd.f32 %v1508_v1, %v1438_v63  ;;  %v3398_v5 = vpop.f32.mrb[5].mxu1  ;;  %v1767_v31 = vrot.slane %v1434_v4, %v1766_v24 }
 0x2e3   : > { %3408 = vmatmul.mubr.msk.f32.vlgmr.msra.gmra.mrb[6].mxu1 %vm1275_vm2, %v1509_v2 }
 0x2e4   : > { %3422 = vmatpush3.msk.msra.mxu1 %vm1685_vm6, %v1670_v55  ;;  %3423 = vmatprep.mubr.msk.f32.mxu1 %vm1678_vm9, %v1668_v6 }
 0x2e7   : > { %3424 = vmatmul.mubr.msk.f32.vlgmr.msra.gmra.mrb[8].mxu1 %vm1678_vm9, %v1669_v8 }
 0x3b6   : > { %v1586_v21 = vpop.f32.mrb[6].mxu1 }
 0x3b7   : > { %v1587_v22 = vadd.f32 %v1586_v21, %v1516_v19  ;;  %v3409_v23 = vpop.f32.mrb[7].mxu1 }
 0x3b9   : > { %3419 = vmatmul.mubr.msk.f32.vlgmr.msra.gmra.mrb[0].mxu0 %vm1275_vm2, %v1587_v22 }
 0x3ba   : > { %v3425_v27 = vpop.f32.mrb[8].mxu1  ;;  %3591 = vmatpush3.bf16.msra.mxu0 %v3588_v16 }
 0x3bb   : > { %v1761_v29 = vadd.f32 %v3425_v27, %v3225_v0  ;;  %v1755_v7 = vpop.f32.mrb[9].mxu1  ;;  %3593 = vmatprep.subr.bf16.mxu0 %v3592_v25 }
 0x3bc   : > { %v1756_v33 = vadd.f32 %v3225_v0, %v1755_v7 }
 0x3bd   : > { %v4300_v35 = vadd.f32 %v1767_v31, %v1761_v29 }
 0x3be   : > { %v4302_v36 = vadd.f32 %v1767_v31, %v1756_v33  ;;  %3595 = vmatpush3.bf16.msra.mxu0 %v3592_v25 }
 0x3c0   : > { %3434 = vmatprep.mubr.msk.f32.mxu0 %vm1275_vm2, %v4302_v36 }
 0x3c1   : > { %3435 = vmatmul.mubr.msk.f32.vlgmr.msra.gmra.mrb[2].mxu0 %vm1275_vm2, %v4300_v35 }
 0x48c   : > { %v4308_v37 = vpop.f32.mrb[0].mxu0 }
 0x48d   : > { %v3420_v38 = vpop.f32.mrb[1].mxu0 }
 0x494   : > { %v3436_v26 = vpop.f32.mrb[2].mxu0 }
 0x495   : > { %v4313_v28 = vadd.f32 %v3436_v26, %v3229_v39  ;;  %v1853_v40 = vpop.f32.mrb[3].mxu0 }
 0x496   : > { %v4315_v30 = vadd.f32 %v3229_v39, %v1853_v40 }
 0x498   : > { %2063 = vrot.lane.b32.xlu0 %v4315_v30, %s3900_s30  ;;  %3441 = vmatprep.mubr.msk.f32.mxu1 %vm1868_vm7, %v4315_v30  ;;  %v4322_v42 = vpack.i.bf16 %v4313_v28, %v4315_v30 }
 0x49a   : > { %3753 = vrot.lane.b32.xlu1 %v4322_v42, %s3901_s2  ;;  %s3910_s2 = smov 8  }
 0x49e   : > { %3758 = vrot.lane.b32.xlu1 %v4322_v42, %s3902_s10  ;;  %s3911_s10 = smov 40  }
 0x4a2   : > { %2065 = vrot.lane.b32.xlu1 %v4313_v28, %s3900_s30  ;;  %s3909_s30 = smov 48  }
 0x50a   : > { %v2064_v48 = vpop.permute.xlu0 %2063 }
 0x50c   : > { %v3754_v32 = vpop.permute.xlu1 %3753 }
 0x50d   : > { %v3756_v3 = vunpack.i.h.bf16 %v3754_v32  ;;  %v3755_v43 = vunpack.i.l.bf16 %v3754_v32 }
 0x50f   : > { %v3596_v45 = vpack.c.bf16 %v3756_v3, %v3755_v43 }
 0x510   : > { %v3759_v41 = vpop.permute.xlu1 %3758 }
 0x511   : > { %v3761_v46 = vunpack.i.h.bf16 %v3759_v41  ;;  %v3760_v17 = vunpack.i.l.bf16 %v3759_v41  ;;  %3598 = vmatprep.subr.msk.bf16.mxu1 %vm4329_vm8, %v3596_v45 }
 0x512   : > { %3601 = vmatpush3.bf16.xpose.msk.msra.mxu1 %vm4329_vm8, %v3596_v45 }
 0x513   : > { %v3606_v47 = vpack.c.bf16 %v3761_v46, %v3760_v17 }
 0x514   : > { %v2066_v49 = vpop.permute.xlu1 %2065 }
 0x515   : > { %3608 = vmatprep.subr.msk.bf16.mxu1 %vm4329_vm8, %v3606_v47 }
 0x519   : > { %3442 = vmatmul.mubr.msk.f32.vlgmr.msra.gmra.mrb[10].mxu1 %vm1868_vm7, %v4313_v28 }
 0x51a   : > { %3611 = vmatpush3.bf16.xpose.msk.msra.mxu1 %vm4329_vm8, %v3606_v47  ;;  %3455 = vmatprep.mubr.msk.f32.mxu1 %vm1868_vm7, %v2064_v48 }
 0x521   : > { %3456 = vmatmul.mubr.msk.f32.vlgmr.msra.gmra.mrb[12].mxu1 %vm1868_vm7, %v2066_v49 }
 0x5ec   : > { %v3443_v50 = vpop.f32.mrb[10].mxu1 }
 0x5ed   : > { %v1953_v51 = vmul.f32 0.35355338, %v3443_v50  ;;  %v1943_v52 = vpop.f32.mrb[11].mxu1 }
 0x5ee   : > { %v1952_v53 = vmul.f32 0.35355338, %v1943_v52 }
 0x5ef   : > { %v1957_v54 = vsel %vm1053_vm1, %v1953_v51, -inf }
 0x5f0   : > { %1958 = vmax.xlane.f32.xlu1 %v1957_v54  ;;  %v1954_v55 = vsel %vm1053_vm1, %v1952_v53, -inf }
 0x5f1   : > { %1955 = vmax.xlane.f32.xlu0 %v1954_v55 }
 0x5f4   : > { %v3457_v44 = vpop.f32.mrb[12].mxu1 }
 0x5f5   : > { %v2145_v56 = vpop.f32.mrb[13].mxu1  ;;  %v2155_v58 = vmul.f32 0.35355338, %v3457_v44 }
 0x5f6   : > { %v2154_v57 = vmul.f32 0.35355338, %v2145_v56 }
 0x5f7   : > { %v2159_v14 = vsel %vm1053_vm1, %v2155_v58, -inf }
 0x5f8   : > { %v2156_v59 = vsel %vm1053_vm1, %v2154_v57, -inf }
 0x5f9   : > { %2157 = vmax.xlane.f32.xlu0 %v2156_v59 }
 0x5fd   : > { %2160 = vmax.xlane.f32.xlu0 %v2159_v14 }
 0x601   : > { %3763 = vrot.lane.b32.xlu1 %v4322_v42, %s3903_s1  ;;  %s4603_s1 = smov 16  }
 0x67d   : > { %v1959_v60 = vpop.xlane.xlu1 %1958 }
 0x67e   : > { %v1961_v61 = vsub.f32 %v1953_v51, %v1959_v60  ;;  %v1956_v62 = vpop.xlane.xlu0 %1955 }
 0x67f   : > { %v1960_v63 = vsub.f32 %v1952_v53, %v1956_v62 }
 0x680   : > { %v1964_v4 = vmul.f32 1.442695, %v1961_v61 }
 0x681   : > { %v1962_v1 = vmul.f32 1.442695, %v1960_v63  ;;  %v3764_v2 = vpop.permute.xlu1 %3763 }
 0x682   : > { %3806 = vpow2.f32 %v1964_v4  ;;  %v3766_v5 = vunpack.i.h.bf16 %v3764_v2  ;;  %v3765_v6 = vunpack.i.l.bf16 %v3764_v2 }
 0x683   : > { %3808 = vpow2.f32 %v1962_v1 }
 0x684   : > { %v3602_v8 = vpack.c.bf16 %v3766_v5, %v3765_v6 }
 0x686   : > { %3603 = vmatprep.subr.bf16.mxu0 %v3602_v8  ;;  %v2158_v9 = vpop.xlane.xlu0 %2157 }
 0x687   : > { %3605 = vmatpush3.bf16.msra.mxu0 %v3602_v8  ;;  %v2162_v22 = vsub.f32 %v2154_v57, %v2158_v9 }
 0x689   : > { %v2164_v23 = vmul.f32 1.442695, %v2162_v22 }
 0x68a   : > { %v2161_v10 = vpop.xlane.xlu0 %2160 }
 0x68b   : > { %v2163_v11 = vsub.f32 %v2155_v58, %v2161_v10 }
 0x68c   : > { %v3807_v12 = vpop.eup %3806 }
 0x68d   : > { %v3809_v15 = vpop.eup %3808  ;;  %v2166_v16 = vmul.f32 1.442695, %v2163_v11  ;;  %v1969_v19 = vsel %vm1053_vm1, %v3807_v12, 0.0 }
 0x68e   : > { %1970 = vadd.xlane.f32.xlu0 %v1969_v19  ;;  %v1966_v13 = vsel %vm1053_vm1, %v3809_v15, 0.0 }
 0x68f   : > { %3810 = vpow2.f32 %v2166_v16  ;;  %1967 = vadd.xlane.f32.xlu1 %v1966_v13 }
 0x690   : > { %3812 = vpow2.f32 %v2164_v23 }
 0x699   : > { %v3811_v20 = vpop.eup %3810 }
 0x69a   : > { %v2171_v21 = vsel %vm1053_vm1, %v3811_v20, 0.0  ;;  %v3813_v25 = vpop.eup %3812 }
 0x69b   : > { %2172 = vadd.xlane.f32.xlu0 %v2171_v21  ;;  %v2168_v0 = vsel %vm1053_vm1, %v3813_v25, 0.0 }
 0x6a0   : > { %3773 = vrot.lane.b32.xlu1 %v4322_v42, %s3904_s7 }
 0x6b1   : > { %3768 = vrot.lane.b32.xlu0 %v4322_v42, %s3905_s8  ;;  %s4604_s8 = sshll.u32 %s4606_s3, 4 }
 0x6b5   : > { %2267 = vrot.lane.b32.xlu0 %v4313_v28, %s3906_s29 }
 0x6c4   : > { %2169 = vadd.xlane.f32.xlu1 %v2168_v0 }
 0x6d5   : > { %2265 = vrot.lane.b32.xlu1 %v4315_v30, %s3906_s29 }
 0x71b   : > { %v1971_v27 = vpop.xlane.xlu0 %1970 }
 0x71c   : > { %3814 = vrcp.f32 %v1971_v27  ;;  %v1968_v29 = vpop.xlane.xlu1 %1967 }
 0x71d   : > { %3816 = vrcp.f32 %v1968_v29 }
 0x720   : > { %v3774_v26 = vpop.permute.xlu1 %3773 }
 0x721   : > { %v3776_v32 = vunpack.i.h.bf16 %v3774_v26  ;;  %v3775_v3 = vunpack.i.l.bf16 %v3774_v26 }
 0x723   : > { %v3616_v46 = vpack.c.bf16 %v3776_v32, %v3775_v3 }
 0x726   : > { %v3815_v31 = vpop.eup %3814 }
 0x727   : > { %v3817_v7 = vpop.eup %3816  ;;  %v1975_v39 = vmul.f32 %v3815_v31, %v3807_v12 }
 0x728   : > { %v2173_v33 = vpop.xlane.xlu0 %2172  ;;  %v1974_v38 = vmul.f32 %v3817_v7, %v3809_v15 }
 0x729   : > { %3818 = vrcp.f32 %v2173_v33 }
 0x72a   : > { %3448 = vmatprep.mubr.msk.f32.mxu0 %vm1053_vm1, %v1974_v38 }
 0x72b   : > { %3449 = vmatmul.mubr.msk.f32.vlgmr.msra.gmra.mrb[4].mxu0 %vm1053_vm1, %v1975_v39 }
 0x72c   : > { %v3769_v40 = vpop.permute.xlu0 %3768 }
 0x72d   : > { %v3771_v43 = vunpack.i.h.bf16 %v3769_v40  ;;  %v3770_v45 = vunpack.i.l.bf16 %v3769_v40 }
 0x72f   : > { %v3612_v41 = vpack.c.bf16 %v3771_v43, %v3770_v45 }
 0x730   : > { %v2268_v52 = vpop.permute.xlu0 %2267 }
 0x731   : > { %3613 = vmatprep.subr.bf16.mxu0 %v3612_v41 }
 0x732   : > { %3615 = vmatpush3.bf16.msra.mxu0 %v3612_v41 }
 0x733   : > { %3618 = vmatprep.subr.msk.bf16.mxu0 %vm4329_vm8, %v3616_v46  ;;  %v3819_v47 = vpop.eup %3818 }
 0x734   : > { %v2177_v50 = vmul.f32 %v3819_v47, %v3811_v20 }
 0x751   : > { %v2170_v17 = vpop.xlane.xlu1 %2169 }
 0x752   : > { %3820 = vrcp.f32 %v2170_v17 }
 0x755   : > { %v2266_v51 = vpop.permute.xlu1 %2265 }
 0x75c   : > { %v3821_v48 = vpop.eup %3820 }
 0x75d   : > { %v2176_v49 = vmul.f32 %v3821_v48, %v3813_v25 }
 0x75f   : > { %3462 = vmatprep.mubr.msk.f32.mxu0 %vm1053_vm1, %v2176_v49 }
 0x760   : > { %3463 = vmatmul.mubr.msk.f32.vlgmr.msra.gmra.mrb[6].mxu0 %vm1053_vm1, %v2177_v50 }
 0x761   : > { %3621 = vmatpush3.bf16.xpose.msk.msra.mxu0 %vm4329_vm8, %v3616_v46  ;;  %3469 = vmatprep.mubr.msk.f32.mxu0 %vm1868_vm7, %v2266_v51 }
 0x768   : > { %3470 = vmatmul.mubr.msk.f32.vlgmr.msra.gmra.mrb[8].mxu0 %vm1868_vm7, %v2268_v52 }
 0x7fe   : > { %v4368_v53 = vpop.f32.mrb[4].mxu0 }
 0x7ff   : > { %v4370_v54 = vpop.f32.mrb[5].mxu0 }
 0x833   : > { %v4372_v55 = vpop.f32.mrb[6].mxu0 }
 0x834   : > { %v4374_v44 = vpop.f32.mrb[7].mxu0 }
 0x83b   : > { %v3471_v56 = vpop.f32.mrb[8].mxu0 }
 0x83c   : > { %v2357_v57 = vmul.f32 0.35355338, %v3471_v56  ;;  %v2347_v58 = vpop.f32.mrb[9].mxu0 }
 0x83d   : > { %v2356_v59 = vmul.f32 0.35355338, %v2347_v58 }
 0x83e   : > { %v2361_v14 = vsel %vm1053_vm1, %v2357_v57, -inf }
 0x83f   : > { %2362 = vmax.xlane.f32.xlu0 %v2361_v14  ;;  %v2358_v60 = vsel %vm1053_vm1, %v2356_v59, -inf  ;;  %v2701_v14 = vld [vmem:[%s4551_s14 + $0x8] sm:$0xff] }
 0x840   : > { %2359 = vmax.xlane.f32.xlu1 %v2358_v60  ;;  %v2702_v60 = vld [vmem:[%s4551_s14 + $0x10] sm:$0xff] }
 0x8cc   : > { %v2363_v61 = vpop.xlane.xlu0 %2362 }
 0x8cd   : > { %v2365_v62 = vsub.f32 %v2357_v57, %v2363_v61  ;;  %v2360_v63 = vpop.xlane.xlu1 %2359 }
 0x8ce   : > { %v2364_v4 = vsub.f32 %v2356_v59, %v2360_v63 }
 0x8cf   : > { %v2368_v1 = vmul.f32 1.442695, %v2365_v62  ;;  %v2703_v62 = vld [vmem:[%s4551_s14 + $0x18] sm:$0xff] }
 0x8d0   : > { %v2366_v2 = vmul.f32 1.442695, %v2364_v4  ;;  %v3640_v63 = vpack.c.bf16 %v2703_v62, %v2702_v60 }
 0x8d1   : > { %3822 = vpow2.f32 %v2368_v1 }
 0x8d2   : > { %3824 = vpow2.f32 %v2366_v2 }
 0x8db   : > { %v3823_v5 = vpop.eup %3822 }
 0x8dc   : > { %v3825_v6 = vpop.eup %3824  ;;  %v2373_v8 = vsel %vm1053_vm1, %v3823_v5, 0.0 }
 0x8dd   : > { %2374 = vadd.xlane.f32.xlu1 %v2373_v8  ;;  %v2370_v9 = vsel %vm1053_vm1, %v3825_v6, 0.0 }
 0x8de   : > { %2371 = vadd.xlane.f32.xlu0 %v2370_v9 }
 0x8ee   : > { %3783 = vrot.lane.b32.xlu1 %v4322_v42, %s3907_s6  ;;  %s832_s6 = scalar_lea.vmem %s4563_s26, %s4604_s8 }
 0x8f2   : > { %2467 = vrot.lane.b32.xlu1 %v4315_v30, %s3908_s9 }
 0x8f4   : > { %3778 = vrot.lane.b32.xlu0 %v4322_v42, %s3909_s30 }
 0x8f8   : > { %2469 = vrot.lane.b32.xlu0 %v4313_v28, %s3908_s9 }
 0x96a   : > { %v2375_v10 = vpop.xlane.xlu1 %2374 }
 0x96b   : > { %3826 = vrcp.f32 %v2375_v10  ;;  %v2372_v11 = vpop.xlane.xlu0 %2371 }
 0x96c   : > { %3828 = vrcp.f32 %v2372_v11 }
 0x96e   : > { %v3784_v12 = vpop.permute.xlu1 %3783 }
 0x96f   : > { %v3779_v15 = vpop.permute.xlu0 %3778  ;;  %v3786_v16 = vunpack.i.h.bf16 %v3784_v12  ;;  %v3785_v19 = vunpack.i.l.bf16 %v3784_v12 }
 0x970   : > { %v3781_v13 = vunpack.i.h.bf16 %v3779_v15  ;;  %v3780_v20 = vunpack.i.l.bf16 %v3779_v15 }
 0x971   : > { %v3626_v22 = vpack.c.bf16 %v3786_v16, %v3785_v19 }
 0x972   : > { %v3622_v21 = vpack.c.bf16 %v3781_v13, %v3780_v20  ;;  %v2468_v0 = vpop.permute.xlu1 %2467  ;;  %v2800_v20 = vld [vmem:[%s4557_s20] sm:$0xff] }
 0x973   : > { %v2470_v27 = vpop.permute.xlu0 %2469 }
 0x974   : > { %3623 = vmatprep.subr.bf16.mxu1 %v3622_v21 }
 0x975   : > { %v3827_v23 = vpop.eup %3826  ;;  %3625 = vmatpush3.bf16.msra.mxu1 %v3622_v21  ;;  %v2802_v21 = vld [vmem:[%s4557_s20 + $0x10] sm:$0xff] }
 0x976   : > { %v3829_v30 = vpop.eup %3828  ;;  %3628 = vmatprep.subr.msk.bf16.mxu1 %vm4329_vm8, %v3626_v22  ;;  %v2379_v25 = vmul.f32 %v3827_v23, %v3823_v5 }
 0x977   : > { %v2378_v28 = vmul.f32 %v3829_v30, %v3825_v6  ;;  %v1594_v30 = vld [vmem:[%s4556_s19] sm:$0x1] }
 0x979   : > { %3476 = vmatprep.mubr.msk.f32.mxu1 %vm1053_vm1, %v2378_v28  ;;  %v3256_v28 = vld [vmem:[%s4552_s15] ss:$0 sm:$0xff] }
 0x97a   : > { %3477 = vmatmul.mubr.msk.f32.vlgmr.msra.gmra.mrb[14].mxu1 %vm1053_vm1, %v2379_v25  ;;  %v1665_v25 = vadd.f32 %v4308_v37, %v1594_v30  ;;  %v2910_v37 = vld [vmem:[%s4559_s22] sm:$0xff] }
 0x97b   : > { %3483 = vmatprep.mubr.msk.f32.mxu1 %vm1868_vm7, %v2468_v0 }
 0x97e   : > { %3631 = vmatpush3.bf16.xpose.msk.msra.mxu1 %vm4329_vm8, %v3626_v22  ;;  %v2803_v22 = vld [vmem:[%s4557_s20 + $0x18] sm:$0xff] }
 0x97f   : > { %v3648_v23 = vpack.c.bf16 %v2803_v22, %v2802_v21  ;;  %v3012_v22 = vld [vmem:[%s4561_s24 + $0x10] sm:$0xff] }
 0x985   : > { %3484 = vmatmul.mubr.msk.f32.vlgmr.msra.gmra.mrb[16].mxu1 %vm1868_vm7, %v2470_v27 }
 0xa4d   : > { %v3478_v29 = vpop.f32.mrb[14].mxu1 }
 0xa4e   : > { %v2458_v31 = vpop.f32.mrb[15].mxu1 }
 0xa58   : > { %v3485_v7 = vpop.f32.mrb[16].mxu1 }
 0xa59   : > { %v2559_v33 = vmul.f32 0.35355338, %v3485_v7  ;;  %v2549_v38 = vpop.f32.mrb[17].mxu1  ;;  %v2797_v7 = vrot.slane %v1665_v25, %v1766_v24  ;;  %v3652_v24 = vpack.c.bf16 %v2911_v18, %v2910_v37 }
 0xa5a   : > { %v2558_v39 = vmul.f32 0.35355338, %v2549_v38 }
 0xa5b   : > { %v2563_v26 = vsel %vm1053_vm1, %v2559_v33, -inf }
 0xa5c   : > { %2564 = vmax.xlane.f32.xlu0 %v2563_v26  ;;  %v2560_v40 = vsel %vm1053_vm1, %v2558_v39, -inf }
 0xa5d   : > { %2561 = vmax.xlane.f32.xlu1 %v2560_v40 }
 0xae9   : > { %v2565_v32 = vpop.xlane.xlu0 %2564 }
 0xaea   : > { %v2567_v3 = vsub.f32 %v2559_v33, %v2565_v32  ;;  %v2562_v43 = vpop.xlane.xlu1 %2561  ;;  %v2914_v32 = vld [vmem:[%s4559_s22 + $0x20] sm:$0xff] }
 0xaeb   : > { %v2566_v34 = vsub.f32 %v2558_v39, %v2562_v43 }
 0xaec   : > { %v2570_v45 = vmul.f32 1.442695, %v2567_v3  ;;  %v2915_v3 = vld [vmem:[%s4559_s22 + $0x28] sm:$0xff] }
 0xaed   : > { %v2568_v41 = vmul.f32 1.442695, %v2566_v34  ;;  %v3660_v43 = vpack.c.bf16 %v2915_v3, %v2914_v32  ;;  %v2916_v34 = vld [vmem:[%s4559_s22 + $0x30] sm:$0xff] }
 0xaee   : > { %3830 = vpow2.f32 %v2570_v45  ;;  %v2917_v45 = vld [vmem:[%s4559_s22 + $0x38] sm:$0xff] }
 0xaef   : > { %3832 = vpow2.f32 %v2568_v41  ;;  %v3664_v41 = vpack.c.bf16 %v2917_v45, %v2916_v34 }
 0xaf8   : > { %v3831_v46 = vpop.eup %3830 }
 0xaf9   : > { %v3833_v17 = vpop.eup %3832  ;;  %v2575_v47 = vsel %vm1053_vm1, %v3831_v46, 0.0 }
 0xafa   : > { %2576 = vadd.xlane.f32.xlu1 %v2575_v47  ;;  %v2572_v48 = vsel %vm1053_vm1, %v3833_v17, 0.0  ;;  %v2920_v47 = vld [vmem:[%s4559_s22 + $0x50] sm:$0xff] }
 0xafb   : > { %2573 = vadd.xlane.f32.xlu0 %v2572_v48 }
 0xb0b   : > { %2671 = vrot.lane.b32.xlu1 %v4374_v44, %s3910_s2 }
 0xb0f   : > { %2673 = vrot.lane.b32.xlu1 %v4372_v55, %s3910_s2 }
 0xb11   : > { %3788 = vrot.lane.b32.xlu0 %v4322_v42, %s3911_s10  ;;  %v2700_v42 = vld [vmem:[%s4551_s14] sm:$0xff] }
 0xb12   : > { %v3636_v61 = vpack.c.bf16 %v2701_v14, %v2700_v42  ;;  %v3259_v14 = vld [vmem:[%s4558_s21] ss:$0 sm:$0xff] }
 0xb13   : > { %2681 = vrot.lane.b32.xlu1 %v3478_v29, %s4603_s1 }
 0xb15   : > { %2679 = vrot.lane.b32.xlu0 %v2458_v31, %s4603_s1  ;;  %s3912_s1 = smov 24  }
 0xb87   : > { %v2577_v49 = vpop.xlane.xlu1 %2576 }
 0xb88   : > { %3834 = vrcp.f32 %v2577_v49  ;;  %v2574_v50 = vpop.xlane.xlu0 %2573  ;;  %v2921_v49 = vld [vmem:[%s4559_s22 + $0x58] sm:$0xff] }
 0xb89   : > { %3836 = vrcp.f32 %v2574_v50  ;;  %v3672_v50 = vpack.c.bf16 %v2921_v49, %v2920_v47 }
 0xb8b   : > { %v2672_v2 = vpop.permute.xlu1 %2671 }
 0xb8c   : > { %v3789_v51 = vpop.permute.xlu0 %3788  ;;  %v2693_v9 = vsel %vm1868_vm7, %v4370_v54, %v2672_v2  ;;  %v2801_v54 = vld [vmem:[%s4557_s20 + $0x8] sm:$0xff] }
 0xb8d   : > { %v3791_v52 = vunpack.i.h.bf16 %v3789_v51  ;;  %v3790_v56 = vunpack.i.l.bf16 %v3789_v51  ;;  %v2922_v51 = vld [vmem:[%s4559_s22 + $0x60] sm:$0xff] }
 0xb8f   : > { %v3632_v57 = vpack.c.bf16 %v3791_v52, %v3790_v56  ;;  %v2674_v5 = vpop.permute.xlu1 %2673  ;;  %v2923_v52 = vld [vmem:[%s4559_s22 + $0x68] sm:$0xff] }
 0xb90   : > { %v2680_v8 = vpop.permute.xlu0 %2679  ;;  %v2694_v11 = vsel %vm1868_vm7, %v4368_v53, %v2674_v5  ;;  %v3644_v53 = vpack.c.bf16 %v2801_v54, %v2800_v20  ;;  %v3676_v56 = vpack.c.bf16 %v2923_v52, %v2922_v51 }
 0xb91   : > { %3633 = vmatprep.subr.bf16.mxu0 %v3632_v57  ;;  %v2695_v12 = vsel %vm1053_vm1, %v2693_v9, %v2680_v8 }
 0xb92   : > { %v3835_v58 = vpop.eup %3834  ;;  %3635 = vmatpush3.bf16.msra.mxu0 %v3632_v57  ;;  %3645 = vmatprep.subr.bf16.mxu1 %v3644_v53  ;;  %v2924_v57 = vld [vmem:[%s4559_s22 + $0x70] sm:$0xff] }
 0xb93   : > { %v3837_v44 = vpop.eup %3836  ;;  %v2581_v59 = vmul.f32 %v3835_v58, %v3831_v46  ;;  %3637 = vmatprep.subr.bf16.mxu0 %v3636_v61  ;;  %v2682_v6 = vpop.permute.xlu1 %2681  ;;  %3647 = vmatpush3.bf16.msra.mxu1 %v3644_v53  ;;  %v2918_v46 = vld [vmem:[%s4559_s22 + $0x40] sm:$0xff]  ;;  %v2925_v58 = vld [vmem:[%s4559_s22 + $0x78] sm:$0xff] }
 0xb94   : > { %v2580_v55 = vmul.f32 %v3837_v44, %v3833_v17  ;;  %v2696_v16 = vsel %vm1053_vm1, %v2694_v11, %v2682_v6  ;;  %3649 = vmatprep.subr.bf16.mxu1 %v3648_v23  ;;  %v2919_v17 = vld [vmem:[%s4559_s22 + $0x48] sm:$0xff]  ;;  %v3680_v44 = vpack.c.bf16 %v2925_v58, %v2924_v57 }
 0xb95   : > { %v3668_v48 = vpack.c.bf16 %v2919_v17, %v2918_v46 }
 0xb96   : > { %3490 = vmatprep.mubr.msk.f32.mxu0 %vm1053_vm1, %v2580_v55  ;;  %v3010_v55 = vld [vmem:[%s4561_s24] sm:$0xff] }
 0xb97   : > { %3491 = vmatmul.mubr.msk.f32.vlgmr.msra.gmra.mrb[10].mxu0 %vm1053_vm1, %v2581_v59  ;;  %3651 = vmatpush3.bf16.msra.mxu1 %v3648_v23  ;;  %v3011_v59 = vld [vmem:[%s4561_s24 + $0x8] sm:$0xff]  ;;  %v3013_v23 = vld [vmem:[%s4561_s24 + $0x18] sm:$0xff] }
 0xb98   : > { %3639 = vmatpush3.bf16.msra.mxu0 %v3636_v61  ;;  %v3684_v42 = vpack.c.bf16 %v3011_v59, %v3010_v55  ;;  %v3688_v30 = vpack.c.bf16 %v3013_v23, %v3012_v22 }
 0xb99   : > { %3641 = vmatprep.subr.bf16.mxu0 %v3640_v63 }
 0xb9a   : > { %3685 = vmatprep.subr.bf16.mxu1 %v3684_v42 }
 0xb9c   : > { %3643 = vmatpush3.bf16.msra.mxu0 %v3640_v63 }
 0xb9d   : > { %3653 = vmatprep.subr.bf16.mxu0 %v3652_v24 }
 0xc6a   : > { %v3492_v4 = vpop.f32.mrb[10].mxu0 }
 0xc6b   : > { %2689 = vrot.lane.b32.xlu1 %v3492_v4, %s3912_s1  ;;  %v2660_v1 = vpop.f32.mrb[11].mxu0 }
 0xc6c   : > { %2687 = vrot.lane.b32.xlu0 %v2660_v1, %s3912_s1 }
 0xcdd   : > { %v2690_v10 = vpop.permute.xlu1 %2689 }
 0xcde   : > { %v2688_v15 = vpop.permute.xlu0 %2687  ;;  %v2699_v13 = vsel %vm2697_vm10, %v2696_v16, %v2690_v10 }
 0xcdf   : > { %v2698_v19 = vsel %vm2697_vm10, %v2695_v12, %v2688_v15 }
 0xce0   : > { %3501 = vmatprep.mubr.msk.f32.mxu0 %vm1275_vm2, %v2698_v19 }
 0xce1   : > { %3502 = vmatmul.mubr.msk.f32.vlgmr.msra.gmra.mrb[12].mxu0 %vm1275_vm2, %v2699_v13 }
 0xce2   : > { %3655 = vmatpush3.bf16.msra.mxu0 %v3652_v24 }
 0xdb4   : > { %v3503_v0 = vpop.f32.mrb[12].mxu0 }
 0xdb5   : > { %v2789_v27 = vadd.f32 %v3503_v0, %v3256_v28  ;;  %v2783_v29 = vpop.f32.mrb[13].mxu0 }
 0xdb6   : > { %v2784_v31 = vadd.f32 %v3256_v28, %v2783_v29  ;;  %v3262_v28 = vld [vmem:[%s4560_s23] ss:$0 sm:$0xff] }
 0xdb7   : > { %v2793_v33 = vadd.f32 %v2789_v27, %v4300_v35  ;;  %v2912_v35 = vld [vmem:[%s4559_s22 + $0x10] sm:$0xff] }
 0xdb8   : > { %v2792_v38 = vadd.f32 %v2784_v31, %v4302_v36  ;;  %v2913_v36 = vld [vmem:[%s4559_s22 + $0x18] sm:$0xff] }
 0xdb9   : > { %v4446_v39 = vadd.f32 %v2797_v7, %v2793_v33  ;;  %v3656_v40 = vpack.c.bf16 %v2913_v36, %v2912_v35  ;;  %v3263_v33 = vld [vmem:[%s4562_s25] ss:$0 sm:$0xff] }
 0xdba   : > { %v4448_v26 = vadd.f32 %v2797_v7, %v2792_v38 }
 0xdbb   : > { %3657 = vmatprep.subr.bf16.mxu0 %v3656_v40 }
 0xdbc   : > { %3512 = vmatprep.mubr.msk.f32.mxu1 %vm1275_vm2, %v4448_v26  ;;  %3659 = vmatpush3.bf16.msra.mxu0 %v3656_v40 }
 0xdbd   : > { %3513 = vmatmul.mubr.msk.f32.vlgmr.msra.gmra.mrb[18].mxu1 %vm1275_vm2, %v4446_v39  ;;  %3661 = vmatprep.subr.bf16.mxu0 %v3660_v43 }
 0xdbe   : > { %3687 = vmatpush3.bf16.msra.mxu1 %v3684_v42 }
 0xdbf   : > { %3689 = vmatprep.subr.bf16.mxu1 %v3688_v30 }
 0xdc0   : > { %3663 = vmatpush3.bf16.msra.mxu0 %v3660_v43 }
 0xdc1   : > { %3665 = vmatprep.subr.bf16.mxu0 %v3664_v41 }
 0xdc2   : > { %3691 = vmatpush3.bf16.msra.mxu1 %v3688_v30 }
 0xdc4   : > { %3667 = vmatpush3.bf16.msra.mxu0 %v3664_v41 }
 0xdc5   : > { %3669 = vmatprep.subr.bf16.mxu0 %v3668_v48 }
 0xdc8   : > { %3671 = vmatpush3.bf16.msra.mxu0 %v3668_v48 }
 0xdc9   : > { %3673 = vmatprep.subr.bf16.mxu0 %v3672_v50 }
 0xdcc   : > { %3675 = vmatpush3.bf16.msra.mxu0 %v3672_v50 }
 0xdcd   : > { %3677 = vmatprep.subr.bf16.mxu0 %v3676_v56 }
 0xdd0   : > { %3679 = vmatpush3.bf16.msra.mxu0 %v3676_v56 }
 0xdd1   : > { %3681 = vmatprep.subr.bf16.mxu0 %v3680_v44 }
 0xdd4   : > { %3683 = vmatpush3.bf16.msra.mxu0 %v3680_v44 }
 0xe90   : > { %v3514_v60 = vpop.f32.mrb[18].mxu1 }
 0xe91   : > { %v2889_v61 = vadd.f32 %v3514_v60, %v3259_v14  ;;  %v2883_v62 = vpop.f32.mrb[19].mxu1 }
 0xe92   : > { %v2884_v63 = vadd.f32 %v3259_v14, %v2883_v62 }
 0xe93   : > { %v2893_v4 = vmul.f32 %v2889_v61, %v2889_v61 }
 0xe94   : > { %v2892_v1 = vmul.f32 %v2884_v63, %v2884_v63 }
 0xe95   : > { %v2895_v2 = vmul.f32 %v2893_v4, %v2889_v61 }
 0xe96   : > { %v2894_v5 = vmul.f32 %v2892_v1, %v2884_v63 }
 0xe97   : > { %v2897_v6 = vmul.f32 0.044715, %v2895_v2 }
 0xe98   : > { %v2896_v8 = vmul.f32 0.044715, %v2894_v5 }
 0xe99   : > { %v2899_v9 = vadd.f32 %v2897_v6, %v2889_v61 }
 0xe9a   : > { %v2898_v10 = vadd.f32 %v2896_v8, %v2884_v63 }
 0xe9b   : > { %v2901_v11 = vmul.f32 0.7978846, %v2899_v9 }
 0xe9c   : > { %v2900_v12 = vmul.f32 0.7978846, %v2898_v10 }
 0xe9d   : > { %3838 = vtanh.f32 %v2901_v11 }
 0xe9e   : > { %3840 = vtanh.f32 %v2900_v12 }
 0xea7   : > { %v3839_v15 = vpop.eup %3838 }
 0xea8   : > { %v3841_v16 = vpop.eup %3840  ;;  %v2905_v19 = vadd.f32 1.0, %v3839_v15 }
 0xea9   : > { %v2904_v13 = vadd.f32 1.0, %v3841_v16 }
 0xeaa   : > { %v2907_v20 = vmul.f32 0.5, %v2905_v19 }
 0xeab   : > { %v2906_v54 = vmul.f32 0.5, %v2904_v13 }
 0xeac   : > { %v2909_v21 = vmul.f32 %v2907_v20, %v2889_v61 }
 0xead   : > { %v2908_v53 = vmul.f32 %v2906_v54, %v2884_v63 }
 0xeaf   : > { %3547 = vmatprep.mubr.f32.mxu0 %v2908_v53 }
 0xeb0   : > { %3548 = vmatmul.mubr.f32.vlgmr.msra.gmra.mrb[14].mxu0 %v2909_v21 }
 0xf83   : > { %v3549_v25 = vpop.f32.mrb[14].mxu0 }
 0xf84   : > { %v3005_v0 = vadd.f32 %v3549_v25, %v3262_v28  ;;  %v2999_v27 = vpop.f32.mrb[15].mxu0 }
 0xf85   : > { %v3000_v29 = vadd.f32 %v3262_v28, %v2999_v27 }
 0xf86   : > { %v3009_v7 = vadd.f32 %v3005_v0, %v4446_v39 }
 0xf87   : > { %v3008_v31 = vadd.f32 %v3000_v29, %v4448_v26 }
 0xf89   : > { %3558 = vmatprep.mubr.msk.f32.mxu1 %vm1275_vm2, %v3008_v31 }
 0xf8a   : > { %3559 = vmatmul.mubr.msk.f32.vlgmr.msra.gmra.mrb[20].mxu1 %vm1275_vm2, %v3009_v7 }
0x105d   : > { %v3560_v38 = vpop.f32.mrb[20].mxu1 }
0x105e   : > { %v3099_v37 = vadd.f32 %v3560_v38, %v3263_v33  ;;  %v3093_v18 = vpop.f32.mrb[21].mxu1 }
0x105f   : > { %v3094_v24 = vadd.f32 %v3263_v33, %v3093_v18 }
0x1060   : > { %3103 = vst.msk [vmem:[%s832_s6 + $0x8] sm:$0xff] %vm1678_vm9, %v3099_v37 }
0x1061   : > { %3102 = vst.msk [vmem:[%s832_s6] sm:$0xff] %vm1678_vm9, %v3094_v24 }
0x1062 PF: > { %s38_s27 = sadd.s32 1, %s3886_s27  }
0x1063   : > { %p35_p5 = scmp.ge.s32.totalorder %s38_s27, 4  }
0x1065   :  { %37 = sbr.rel (!%p35_p5) target bundleno = 14 (0xe), region = 166 }
0x106c   :  { %3125 = vsyncpa [#allocation3], 1 }
0x106d   :  { %3127 = vsyncpa [#allocation3 + $0x1], 1 }
0x106e   :  { %3128 = vsyncpa [#allocation5], 1 }

</bundles_post_ra>
